<compile_context>
chip_gen: v6e
topology: v6e:2x2x1
jax: 0.10.0
libtpu: 0.0.40
codegen_flags: <defaults>
</compile_context>

<pallas_src>
import functools

import jax
import jax.numpy as jnp
from jax import lax
from jax.experimental import pallas as pl
from jax.experimental.pallas import tpu as pltpu

_FULL_UNROLL_MAX_STEPS = 64  # fully unroll the time loop for S <= this


def lstm_ved_kernel(ts_ref, wih_e_ref, whh_e_ref, b_e_ref,
                    wm_ref, bm_ref,
                    wih_d_ref, whh_d_ref, b_d_ref,
                    wo_ref, bo_ref,
                    out_ref,
                    gx_ref, h_ref, *, seq_len):
    """One batch tile: encoder LSTM -> latent mean -> decoder LSTM -> output head.

    ts_ref : (S*B, F)    time-major flattened input tile
    out_ref: (S*B, F)    time-major flattened output tile
    gx_ref : (S*B, 4H)   scratch: hoisted input-to-gate projections (reused enc/dec)
    h_ref  : (S*B, H)    scratch: per-step hidden states (reused enc/dec)
    """
    SB, _ = ts_ref.shape
    H = whh_e_ref.shape[0]
    S = seq_len
    B = SB // S

    f32 = jnp.float32
    bf16 = jnp.bfloat16

    # Load weights once; MXU operands in bf16, accumulation in f32.
    wih_e = wih_e_ref[...].astype(bf16)
    whh_e = whh_e_ref[...].astype(bf16)
    wih_d = wih_d_ref[...].astype(bf16)
    whh_d = whh_d_ref[...].astype(bf16)
    wm = wm_ref[...].astype(bf16)
    wo = wo_ref[...].astype(bf16)
    b_e = b_e_ref[...]
    b_d = b_d_ref[...]
    bm = bm_ref[...]
    bo = bo_ref[...]

    zeros_h = jnp.zeros((B, H), f32)

    def make_step(whh):
        # Per-step work: ONLY the recurrent matmul + gate math (PyTorch order i,f,g,o).
        def step(row, h, c):
            gates = gx_ref[pl.ds(row, B), :] + jnp.dot(
                h.astype(bf16), whh, preferred_element_type=f32)
            sig = jax.nn.sigmoid(gates)          # full-vreg EUP launch
            tnh = jnp.tanh(gates)                # full-vreg EUP launch
            i = sig[:, 0 * H:1 * H]
            f = sig[:, 1 * H:2 * H]
            g = tnh[:, 2 * H:3 * H]
            o = sig[:, 3 * H:4 * H]
            c_new = f * c + i * g
            h_new = o * jnp.tanh(c_new)
            h_ref[pl.ds(row, B), :] = h_new
            return h_new, c_new
        return step

    def run_time_loop(step):
        if S <= _FULL_UNROLL_MAX_STEPS:
            # Full static unroll: static ref slices + max scheduler visibility.
            h, c = zeros_h, zeros_h
            for t in range(S):
                h, c = step(t * B, h, c)
        else:
            def body(t, carry):
                row = pl.multiple_of(t * B, B)
                return step(row, carry[0], carry[1])
            lax.fori_loop(0, S, body, (zeros_h, zeros_h), unroll=8)

    # ---- Encoder: hoisted input projection (one dense matmul), then recurrence ----
    gx_ref[...] = jnp.dot(ts_ref[...].astype(bf16), wih_e,
                          preferred_element_type=f32) + b_e
    run_time_loop(make_step(whh_e))

    # ---- Lambda (eval: latent mean) + hoisted decoder input projection ----
    h_enc = h_ref[...].astype(bf16)                                   # (S*B, H)
    z = jnp.dot(h_enc, wm, preferred_element_type=f32) + bm           # (S*B, L)
    gx_ref[...] = jnp.dot(z.astype(bf16), wih_d,
                          preferred_element_type=f32) + b_d
    run_time_loop(make_step(whh_d))

    # ---- Output head: one dense matmul + one bulk store ----
    out_ref[...] = jnp.dot(h_ref[...].astype(bf16), wo,
                           preferred_element_type=f32) + bo


def _vmem_limit_bytes(S, bb, F, H, L):
    """Generous per-grid-step VMEM budget estimate (bytes)."""
    rows = S * bb
    io_tiles = rows * 2 * F
    scratch = rows * (4 * H + H)
    weights = (F + H + L + 1) * 4 * H + H * (L + F) + (L + F)
    temps = rows * (4 * H + H + L + F)
    words = 3 * io_tiles + scratch + 2 * weights + 2 * temps
    est = 4 * 4 * words                                    # f32 + 4x margin
    return int(min(max(est, 16 * 1024 * 1024), 64 * 1024 * 1024))


def lstm_ved_forward(ts_bsf, params, *, batch_block=None, interpret=False):
    """ts_bsf: (B, S, F) batch-first, like the PyTorch module. Returns (B, S, F)."""
    B, S, F = ts_bsf.shape
    H = params["whh_e"].shape[0]
    L = params["wm"].shape[1]

    if batch_block is None or batch_block >= B:
        batch_block = B
    assert B % batch_block == 0, "batch_block must divide the batch size"
    bb = batch_block
    n_tiles = B // bb

    # Layout plumbing (wrapper side, cheap): batch-first (B,S,F) -> per-tile
    # time-major flattened (n_tiles, S*bb, F) so the kernel gets contiguous
    # per-timestep rows and dense post-loop matmuls/stores.
    x = ts_bsf.astype(jnp.float32)
    x = x.reshape(n_tiles, bb, S, F).transpose(0, 2, 1, 3).reshape(n_tiles, S * bb, F)

    kernel = functools.partial(lstm_ved_kernel, seq_len=S)

    tile_spec = lambda last: pl.BlockSpec((None, S * bb, last), lambda i: (i, 0, 0))
    wspec = lambda a: pl.BlockSpec(a.shape, lambda i: (0, 0))

    in_specs = [
        tile_spec(F),
        wspec(params["wih_e"]), wspec(params["whh_e"]), wspec(params["b_e"]),
        wspec(params["wm"]), wspec(params["bm"]),
        wspec(params["wih_d"]), wspec(params["whh_d"]), wspec(params["b_d"]),
        wspec(params["wo"]), wspec(params["bo"]),
    ]

    out_tiles = pl.pallas_call(
        kernel,
        out_shape=jax.ShapeDtypeStruct((n_tiles, S * bb, F), jnp.float32),
        grid=(n_tiles,),
        in_specs=in_specs,
        out_specs=tile_spec(F),
        scratch_shapes=[
            pltpu.VMEM((S * bb, 4 * H), jnp.float32),   # hoisted x-to-gate buffer
            pltpu.VMEM((S * bb, H), jnp.float32),       # hidden-state buffer
        ],
        compiler_params=pltpu.CompilerParams(
            dimension_semantics=("parallel",),
            vmem_limit_bytes=_vmem_limit_bytes(S, bb, F, H, L),
        ),
        interpret=interpret,
    )(x, params["wih_e"], params["whh_e"], params["b_e"],
      params["wm"], params["bm"],
      params["wih_d"], params["whh_d"], params["b_d"],
      params["wo"], params["bo"])

    # Invert the layout plumbing: (n_tiles, S*bb, F) -> (B, S, F)
    out = out_tiles.reshape(n_tiles, S, bb, F).transpose(0, 2, 1, 3).reshape(B, S, F)
    return out


def init_params(key, n_features, hidden_size, latent_length):
    """Deterministic synthetic parameters matching the module's shapes.

    Weights are stored transposed (in_dim, out_dim) so kernels compute x @ W.
    LSTM biases are the sum of PyTorch's b_ih + b_hh.
    """
    ks = jax.random.split(key, 12)
    k_lstm = 1.0 / float(hidden_size) ** 0.5

    def u(k, shape, bound):
        return jax.random.uniform(k, shape, jnp.float32, -bound, bound)

    def xavier(k, shape):
        bound = (6.0 / (shape[0] + shape[1])) ** 0.5
        return jax.random.uniform(k, shape, jnp.float32, -bound, bound)

    return {
        # encoder LSTM (1 layer)
        "wih_e": u(ks[0], (n_features, 4 * hidden_size), k_lstm),
        "whh_e": u(ks[1], (hidden_size, 4 * hidden_size), k_lstm),
        "b_e": u(ks[2], (1, 4 * hidden_size), k_lstm) + u(ks[3], (1, 4 * hidden_size), k_lstm),
        # Lambda: hidden_to_mean (xavier_uniform like the module)
        "wm": xavier(ks[4], (hidden_size, latent_length)),
        "bm": u(ks[5], (1, latent_length), k_lstm),
        # decoder LSTM (1 layer), input = latent_length
        "wih_d": u(ks[6], (latent_length, 4 * hidden_size), k_lstm),
        "whh_d": u(ks[7], (hidden_size, 4 * hidden_size), k_lstm),
        "b_d": u(ks[8], (1, 4 * hidden_size), k_lstm) + u(ks[9], (1, 4 * hidden_size), k_lstm),
        # hidden2output
        "wo": u(ks[10], (hidden_size, n_features), k_lstm),
        "bo": u(ks[11], (1, n_features), k_lstm),
    }


def reference_forward_f32(ts_bsf, p):
    """Module-faithful pure-JAX f32 reference (per-step LSTM, like PyTorch)."""
    ts = ts_bsf.astype(jnp.float32)
    B, S, F = ts.shape
    H = p["whh_e"].shape[0]

    def cell(x_t, h, c, wih, whh, b):
        gates = x_t @ wih + h @ whh + b
        i = jax.nn.sigmoid(gates[:, :H])
        f = jax.nn.sigmoid(gates[:, H:2 * H])
        g = jnp.tanh(gates[:, 2 * H:3 * H])
        o = jax.nn.sigmoid(gates[:, 3 * H:])
        c = f * c + i * g
        h = o * jnp.tanh(c)
        return h, c

    h0 = jnp.zeros((B, H), jnp.float32)
    xs = jnp.transpose(ts, (1, 0, 2))                               # (S, B, F)

    def enc(carry, x_t):
        h, c = cell(x_t, carry[0], carry[1], p["wih_e"], p["whh_e"], p["b_e"])
        return (h, c), h
    _, hs = lax.scan(enc, (h0, h0), xs)

    z = hs @ p["wm"] + p["bm"]                                      # (S, B, L)

    def dec(carry, z_t):
        h, c = cell(z_t, carry[0], carry[1], p["wih_d"], p["whh_d"], p["b_d"])
        return (h, c), h
    _, hd = lax.scan(dec, (h0, h0), z)

    out = hd @ p["wo"] + p["bo"]                                    # (S, B, F)
    return jnp.transpose(out, (1, 0, 2))


def reference_forward_mixed(ts_bsf, p):
    """Reference mirroring the kernel's mixed precision (bf16 operands, f32 accumulate)."""
    bf16 = jnp.bfloat16
    ts = ts_bsf.astype(jnp.float32)
    B, S, F = ts.shape
    H = p["whh_e"].shape[0]

    def dot(a, b):
        return jnp.dot(a.astype(bf16), b.astype(bf16),
                       preferred_element_type=jnp.float32)

    def cell(gx_t, h, c, whh):
        gates = gx_t + dot(h, whh)
        sig = jax.nn.sigmoid(gates)
        tnh = jnp.tanh(gates)
        i, f, g, o = sig[:, :H], sig[:, H:2 * H], tnh[:, 2 * H:3 * H], sig[:, 3 * H:]
        c = f * c + i * g
        h = o * jnp.tanh(c)
        return h, c

    h0 = jnp.zeros((B, H), jnp.float32)
    xs = jnp.transpose(ts, (1, 0, 2))                               # (S, B, F)
    gx_e = dot(xs.reshape(S * B, F), p["wih_e"]).reshape(S, B, -1) + p["b_e"]

    def enc(carry, gx_t):
        h, c = cell(gx_t, carry[0], carry[1], p["whh_e"])
        return (h, c), h
    _, hs = lax.scan(enc, (h0, h0), gx_e)

    z = dot(hs.reshape(S * B, H), p["wm"]).reshape(S, B, -1) + p["bm"]
    gx_d = dot(z.reshape(S * B, -1), p["wih_d"]).reshape(S, B, -1) + p["b_d"]

    def dec(carry, gx_t):
        h, c = cell(gx_t, carry[0], carry[1], p["whh_d"])
        return (h, c), h
    _, hd = lax.scan(dec, (h0, h0), gx_d)

    out = dot(hd.reshape(S * B, H), p["wo"]) + p["bo"]              # (S*B, F)
    return jnp.transpose(out.reshape(S, B, F), (1, 0, 2))


if __name__ == "__main__":
    # small shapes consistent with the module's forward
    B, S, F, H, L = 2, 8, 4, 32, 16   # batch, seq, n_features, hidden_size, latent_length

    key = jax.random.PRNGKey(0)
    kp, kx = jax.random.split(key)
    params = init_params(kp, F, H, L)
    ts_batch = jax.random.normal(kx, (B, S, F), jnp.float32)

    out = jax.block_until_ready(lstm_ved_forward(ts_batch, params))
    assert out.shape == (B, S, F)
    assert bool(jnp.all(jnp.isfinite(out)))

    # Tight check against a JAX mirror of the same mixed-precision math.
    ref_mixed = reference_forward_mixed(ts_batch, params)
    assert jnp.allclose(out, ref_mixed, atol=1e-3, rtol=1e-3), \
        "Pallas output mismatch vs mixed-precision JAX mirror"

    # Semantic check against the module-faithful f32 reference; tolerance reflects
    # bf16 MXU operands (f32 accumulation) vs a pure-f32 recurrence.
    ref_f32 = reference_forward_f32(ts_batch, params)
    assert jnp.allclose(out, ref_f32, atol=3e-2, rtol=3e-2), \
        "Pallas output mismatch vs f32 module reference"

    print("KERNEL_OK")
</pallas_src>

<mosaic_0001>
module attributes {stable_mosaic.version = 11 : i64} {
  func.func @lstm_ved_kernel(%arg0: i32, %arg1: memref<1x16x4xf32, #tpu.memory_space<vmem>>, %arg2: memref<4x128xf32, #tpu.memory_space<vmem>>, %arg3: memref<32x128xf32, #tpu.memory_space<vmem>>, %arg4: memref<1x128xf32, #tpu.memory_space<vmem>>, %arg5: memref<32x16xf32, #tpu.memory_space<vmem>>, %arg6: memref<1x16xf32, #tpu.memory_space<vmem>>, %arg7: memref<16x128xf32, #tpu.memory_space<vmem>>, %arg8: memref<32x128xf32, #tpu.memory_space<vmem>>, %arg9: memref<1x128xf32, #tpu.memory_space<vmem>>, %arg10: memref<32x4xf32, #tpu.memory_space<vmem>>, %arg11: memref<1x4xf32, #tpu.memory_space<vmem>>, %arg12: memref<1x16x4xf32, #tpu.memory_space<vmem>>, %arg13: memref<16x128xf32, #tpu.memory_space<vmem>>, %arg14: memref<16x32xf32, #tpu.memory_space<vmem>>) attributes {dimension_semantics = [#tpu.dimension_semantics<parallel>], iteration_bounds = array<i64: 1>, scalar_prefetch = 0 : i64, scratch_operands = 2 : i64, tpu.core_type = #tpu.core_type<tc>, window_params = [{transform_indices = @transform_0, window_bounds = array<i64: 1, 16, 4>}, {pipeline_mode = #tpu.pipeline_mode<synchronous>, transform_indices = @transform_1, window_bounds = array<i64: 4, 128>}, {pipeline_mode = #tpu.pipeline_mode<synchronous>, transform_indices = @transform_2, window_bounds = array<i64: 32, 128>}, {pipeline_mode = #tpu.pipeline_mode<synchronous>, transform_indices = @transform_3, window_bounds = array<i64: 1, 128>}, {pipeline_mode = #tpu.pipeline_mode<synchronous>, transform_indices = @transform_4, window_bounds = array<i64: 32, 16>}, {pipeline_mode = #tpu.pipeline_mode<synchronous>, transform_indices = @transform_5, window_bounds = array<i64: 1, 16>}, {pipeline_mode = #tpu.pipeline_mode<synchronous>, transform_indices = @transform_6, window_bounds = array<i64: 16, 128>}, {pipeline_mode = #tpu.pipeline_mode<synchronous>, transform_indices = @transform_7, window_bounds = array<i64: 32, 128>}, {pipeline_mode = #tpu.pipeline_mode<synchronous>, transform_indices = @transform_8, window_bounds = array<i64: 1, 128>}, {pipeline_mode = #tpu.pipeline_mode<synchronous>, transform_indices = @transform_9, window_bounds = array<i64: 32, 4>}, {pipeline_mode = #tpu.pipeline_mode<synchronous>, transform_indices = @transform_10, window_bounds = array<i64: 1, 4>}, {transform_indices = @transform_11, window_bounds = array<i64: 1, 16, 4>}]} {
    %c0 = arith.constant 0 : index
    %c0_0 = arith.constant 0 : index
    %0 = vector.load %arg2[%c0, %c0_0] : memref<4x128xf32, #tpu.memory_space<vmem>>, vector<4x128xf32>
    %1 = arith.truncf %0 : vector<4x128xf32> to vector<4x128xbf16>
    %c0_1 = arith.constant 0 : index
    %c0_2 = arith.constant 0 : index
    %2 = vector.load %arg3[%c0_1, %c0_2] : memref<32x128xf32, #tpu.memory_space<vmem>>, vector<32x128xf32>
    %3 = arith.truncf %2 : vector<32x128xf32> to vector<32x128xbf16>
    %c0_3 = arith.constant 0 : index
    %c0_4 = arith.constant 0 : index
    %4 = vector.load %arg7[%c0_3, %c0_4] : memref<16x128xf32, #tpu.memory_space<vmem>>, vector<16x128xf32>
    %5 = arith.truncf %4 : vector<16x128xf32> to vector<16x128xbf16>
    %c0_5 = arith.constant 0 : index
    %c0_6 = arith.constant 0 : index
    %6 = vector.load %arg8[%c0_5, %c0_6] : memref<32x128xf32, #tpu.memory_space<vmem>>, vector<32x128xf32>
    %7 = arith.truncf %6 : vector<32x128xf32> to vector<32x128xbf16>
    %c0_7 = arith.constant 0 : index
    %c0_8 = arith.constant 0 : index
    %8 = vector.load %arg5[%c0_7, %c0_8] : memref<32x16xf32, #tpu.memory_space<vmem>>, vector<32x16xf32>
    %9 = arith.truncf %8 : vector<32x16xf32> to vector<32x16xbf16>
    %c0_9 = arith.constant 0 : index
    %c0_10 = arith.constant 0 : index
    %10 = vector.load %arg10[%c0_9, %c0_10] : memref<32x4xf32, #tpu.memory_space<vmem>>, vector<32x4xf32>
    %11 = arith.truncf %10 : vector<32x4xf32> to vector<32x4xbf16>
    %c0_11 = arith.constant 0 : index
    %c0_12 = arith.constant 0 : index
    %12 = vector.load %arg4[%c0_11, %c0_12] : memref<1x128xf32, #tpu.memory_space<vmem>>, vector<1x128xf32>
    %c0_13 = arith.constant 0 : index
    %c0_14 = arith.constant 0 : index
    %13 = vector.load %arg9[%c0_13, %c0_14] : memref<1x128xf32, #tpu.memory_space<vmem>>, vector<1x128xf32>
    %c0_15 = arith.constant 0 : index
    %c0_16 = arith.constant 0 : index
    %14 = vector.load %arg6[%c0_15, %c0_16] : memref<1x16xf32, #tpu.memory_space<vmem>>, vector<1x16xf32>
    %c0_17 = arith.constant 0 : index
    %c0_18 = arith.constant 0 : index
    %15 = vector.load %arg11[%c0_17, %c0_18] : memref<1x4xf32, #tpu.memory_space<vmem>>, vector<1x4xf32>
    %cst = arith.constant 0.000000e+00 : f32
    %16 = vector.broadcast %cst : f32 to vector<2x32xf32>
    %c0_19 = arith.constant 0 : index
    %c0_20 = arith.constant 0 : index
    %c0_21 = arith.constant 0 : index
    %17 = vector.load %arg1[%c0_19, %c0_20, %c0_21] : memref<1x16x4xf32, #tpu.memory_space<vmem>>, vector<1x16x4xf32>
    %18 = vector.shape_cast %17 : vector<1x16x4xf32> to vector<16x4xf32>
    %19 = arith.truncf %18 : vector<16x4xf32> to vector<16x4xbf16>
    %cst_22 = arith.constant dense<0.000000e+00> : vector<16x128xf32>
    %20 = tpu.matmul %19, %1, %cst_22 {dimension_numbers = #tpu.dot_dimension_numbers<[1], [0], [0], [1], [0, 0, 1, 1], [], []>} : vector<16x4xbf16>, vector<4x128xbf16>, vector<16x128xf32> -> vector<16x128xf32>
    %21 = vector.broadcast %12 : vector<1x128xf32> to vector<16x128xf32>
    %22 = arith.addf %20, %21 : vector<16x128xf32>
    %c0_23 = arith.constant 0 : index
    %c0_24 = arith.constant 0 : index
    %23 = vector.load %arg13[%c0_23, %c0_24] : memref<16x128xf32, #tpu.memory_space<vmem>>, vector<16x128xf32>
    tpu.vector_store %arg13[%c0_23, %c0_24], %22 {strides = array<i32>} : memref<16x128xf32, #tpu.memory_space<vmem>>, vector<16x128xf32>,
    %c0_25 = arith.constant 0 : index
    %c0_26 = arith.constant 0 : index
    %24 = vector.load %arg13[%c0_25, %c0_26] : memref<16x128xf32, #tpu.memory_space<vmem>>, vector<2x128xf32>
    %25 = arith.truncf %16 : vector<2x32xf32> to vector<2x32xbf16>
    %cst_27 = arith.constant dense<0.000000e+00> : vector<2x128xf32>
    %26 = tpu.matmul %25, %3, %cst_27 {dimension_numbers = #tpu.dot_dimension_numbers<[1], [0], [0], [1], [0, 0, 1, 1], [], []>} : vector<2x32xbf16>, vector<32x128xbf16>, vector<2x128xf32> -> vector<2x128xf32>
    %27 = arith.addf %24, %26 : vector<2x128xf32>
    %28 = arith.negf %27 : vector<2x128xf32>
    %29 = math.exp %28 : vector<2x128xf32>
    %cst_28 = arith.constant 1.000000e+00 : f32
    %30 = vector.broadcast %cst_28 : f32 to vector<2x128xf32>
    %31 = arith.addf %30, %29 : vector<2x128xf32>
    %32 = arith.divf %30, %31 : vector<2x128xf32>
    %33 = math.tanh %27 : vector<2x128xf32>
    %34 = vector.extract_strided_slice %32 {offsets = [0, 0], sizes = [2, 32], strides = [1, 1]} : vector<2x128xf32> to vector<2x32xf32>
    %35 = vector.extract_strided_slice %32 {offsets = [0, 32], sizes = [2, 32], strides = [1, 1]} : vector<2x128xf32> to vector<2x32xf32>
    %36 = vector.extract_strided_slice %33 {offsets = [0, 64], sizes = [2, 32], strides = [1, 1]} : vector<2x128xf32> to vector<2x32xf32>
    %37 = vector.extract_strided_slice %32 {offsets = [0, 96], sizes = [2, 32], strides = [1, 1]} : vector<2x128xf32> to vector<2x32xf32>
    %38 = arith.mulf %35, %16 : vector<2x32xf32>
    %39 = arith.mulf %34, %36 : vector<2x32xf32>
    %40 = arith.addf %38, %39 : vector<2x32xf32>
    %41 = math.tanh %40 : vector<2x32xf32>
    %42 = arith.mulf %37, %41 : vector<2x32xf32>
    %c0_29 = arith.constant 0 : index
    %c0_30 = arith.constant 0 : index
    %43 = vector.load %arg14[%c0_29, %c0_30] : memref<16x32xf32, #tpu.memory_space<vmem>>, vector<2x32xf32>
    tpu.vector_store %arg14[%c0_29, %c0_30], %42 {strides = array<i32>} : memref<16x32xf32, #tpu.memory_space<vmem>>, vector<2x32xf32>,
    %c2 = arith.constant 2 : index
    %c0_31 = arith.constant 0 : index
    %44 = vector.load %arg13[%c2, %c0_31] : memref<16x128xf32, #tpu.memory_space<vmem>>, vector<2x128xf32>
    %45 = arith.truncf %42 : vector<2x32xf32> to vector<2x32xbf16>
    %cst_32 = arith.constant dense<0.000000e+00> : vector<2x128xf32>
    %46 = tpu.matmul %45, %3, %cst_32 {dimension_numbers = #tpu.dot_dimension_numbers<[1], [0], [0], [1], [0, 0, 1, 1], [], []>} : vector<2x32xbf16>, vector<32x128xbf16>, vector<2x128xf32> -> vector<2x128xf32>
    %47 = arith.addf %44, %46 : vector<2x128xf32>
    %48 = arith.negf %47 : vector<2x128xf32>
    %49 = math.exp %48 : vector<2x128xf32>
    %cst_33 = arith.constant 1.000000e+00 : f32
    %50 = vector.broadcast %cst_33 : f32 to vector<2x128xf32>
    %51 = arith.addf %50, %49 : vector<2x128xf32>
    %52 = arith.divf %50, %51 : vector<2x128xf32>
    %53 = math.tanh %47 : vector<2x128xf32>
    %54 = vector.extract_strided_slice %52 {offsets = [0, 0], sizes = [2, 32], strides = [1, 1]} : vector<2x128xf32> to vector<2x32xf32>
    %55 = vector.extract_strided_slice %52 {offsets = [0, 32], sizes = [2, 32], strides = [1, 1]} : vector<2x128xf32> to vector<2x32xf32>
    %56 = vector.extract_strided_slice %53 {offsets = [0, 64], sizes = [2, 32], strides = [1, 1]} : vector<2x128xf32> to vector<2x32xf32>
    %57 = vector.extract_strided_slice %52 {offsets = [0, 96], sizes = [2, 32], strides = [1, 1]} : vector<2x128xf32> to vector<2x32xf32>
    %58 = arith.mulf %55, %40 : vector<2x32xf32>
    %59 = arith.mulf %54, %56 : vector<2x32xf32>
    %60 = arith.addf %58, %59 : vector<2x32xf32>
    %61 = math.tanh %60 : vector<2x32xf32>
    %62 = arith.mulf %57, %61 : vector<2x32xf32>
    %c2_34 = arith.constant 2 : index
    %c0_35 = arith.constant 0 : index
    %63 = vector.load %arg14[%c2_34, %c0_35] : memref<16x32xf32, #tpu.memory_space<vmem>>, vector<2x32xf32>
    tpu.vector_store %arg14[%c2_34, %c0_35], %62 {strides = array<i32>} : memref<16x32xf32, #tpu.memory_space<vmem>>, vector<2x32xf32>,
    %c4 = arith.constant 4 : index
    %c0_36 = arith.constant 0 : index
    %64 = vector.load %arg13[%c4, %c0_36] : memref<16x128xf32, #tpu.memory_space<vmem>>, vector<2x128xf32>
    %65 = arith.truncf %62 : vector<2x32xf32> to vector<2x32xbf16>
    %cst_37 = arith.constant dense<0.000000e+00> : vector<2x128xf32>
    %66 = tpu.matmul %65, %3, %cst_37 {dimension_numbers = #tpu.dot_dimension_numbers<[1], [0], [0], [1], [0, 0, 1, 1], [], []>} : vector<2x32xbf16>, vector<32x128xbf16>, vector<2x128xf32> -> vector<2x128xf32>
    %67 = arith.addf %64, %66 : vector<2x128xf32>
    %68 = arith.negf %67 : vector<2x128xf32>
    %69 = math.exp %68 : vector<2x128xf32>
    %cst_38 = arith.constant 1.000000e+00 : f32
    %70 = vector.broadcast %cst_38 : f32 to vector<2x128xf32>
    %71 = arith.addf %70, %69 : vector<2x128xf32>
    %72 = arith.divf %70, %71 : vector<2x128xf32>
    %73 = math.tanh %67 : vector<2x128xf32>
    %74 = vector.extract_strided_slice %72 {offsets = [0, 0], sizes = [2, 32], strides = [1, 1]} : vector<2x128xf32> to vector<2x32xf32>
    %75 = vector.extract_strided_slice %72 {offsets = [0, 32], sizes = [2, 32], strides = [1, 1]} : vector<2x128xf32> to vector<2x32xf32>
    %76 = vector.extract_strided_slice %73 {offsets = [0, 64], sizes = [2, 32], strides = [1, 1]} : vector<2x128xf32> to vector<2x32xf32>
    %77 = vector.extract_strided_slice %72 {offsets = [0, 96], sizes = [2, 32], strides = [1, 1]} : vector<2x128xf32> to vector<2x32xf32>
    %78 = arith.mulf %75, %60 : vector<2x32xf32>
    %79 = arith.mulf %74, %76 : vector<2x32xf32>
    %80 = arith.addf %78, %79 : vector<2x32xf32>
    %81 = math.tanh %80 : vector<2x32xf32>
    %82 = arith.mulf %77, %81 : vector<2x32xf32>
    %c4_39 = arith.constant 4 : index
    %c0_40 = arith.constant 0 : index
    %83 = vector.load %arg14[%c4_39, %c0_40] : memref<16x32xf32, #tpu.memory_space<vmem>>, vector<2x32xf32>
    tpu.vector_store %arg14[%c4_39, %c0_40], %82 {strides = array<i32>} : memref<16x32xf32, #tpu.memory_space<vmem>>, vector<2x32xf32>,
    %c6 = arith.constant 6 : index
    %c0_41 = arith.constant 0 : index
    %84 = vector.load %arg13[%c6, %c0_41] : memref<16x128xf32, #tpu.memory_space<vmem>>, vector<2x128xf32>
    %85 = arith.truncf %82 : vector<2x32xf32> to vector<2x32xbf16>
    %cst_42 = arith.constant dense<0.000000e+00> : vector<2x128xf32>
    %86 = tpu.matmul %85, %3, %cst_42 {dimension_numbers = #tpu.dot_dimension_numbers<[1], [0], [0], [1], [0, 0, 1, 1], [], []>} : vector<2x32xbf16>, vector<32x128xbf16>, vector<2x128xf32> -> vector<2x128xf32>
    %87 = arith.addf %84, %86 : vector<2x128xf32>
    %88 = arith.negf %87 : vector<2x128xf32>
    %89 = math.exp %88 : vector<2x128xf32>
    %cst_43 = arith.constant 1.000000e+00 : f32
    %90 = vector.broadcast %cst_43 : f32 to vector<2x128xf32>
    %91 = arith.addf %90, %89 : vector<2x128xf32>
    %92 = arith.divf %90, %91 : vector<2x128xf32>
    %93 = math.tanh %87 : vector<2x128xf32>
    %94 = vector.extract_strided_slice %92 {offsets = [0, 0], sizes = [2, 32], strides = [1, 1]} : vector<2x128xf32> to vector<2x32xf32>
    %95 = vector.extract_strided_slice %92 {offsets = [0, 32], sizes = [2, 32], strides = [1, 1]} : vector<2x128xf32> to vector<2x32xf32>
    %96 = vector.extract_strided_slice %93 {offsets = [0, 64], sizes = [2, 32], strides = [1, 1]} : vector<2x128xf32> to vector<2x32xf32>
    %97 = vector.extract_strided_slice %92 {offsets = [0, 96], sizes = [2, 32], strides = [1, 1]} : vector<2x128xf32> to vector<2x32xf32>
    %98 = arith.mulf %95, %80 : vector<2x32xf32>
    %99 = arith.mulf %94, %96 : vector<2x32xf32>
    %100 = arith.addf %98, %99 : vector<2x32xf32>
    %101 = math.tanh %100 : vector<2x32xf32>
    %102 = arith.mulf %97, %101 : vector<2x32xf32>
    %c6_44 = arith.constant 6 : index
    %c0_45 = arith.constant 0 : index
    %103 = vector.load %arg14[%c6_44, %c0_45] : memref<16x32xf32, #tpu.memory_space<vmem>>, vector<2x32xf32>
    tpu.vector_store %arg14[%c6_44, %c0_45], %102 {strides = array<i32>} : memref<16x32xf32, #tpu.memory_space<vmem>>, vector<2x32xf32>,
    %c8 = arith.constant 8 : index
    %c0_46 = arith.constant 0 : index
    %104 = vector.load %arg13[%c8, %c0_46] : memref<16x128xf32, #tpu.memory_space<vmem>>, vector<2x128xf32>
    %105 = arith.truncf %102 : vector<2x32xf32> to vector<2x32xbf16>
    %cst_47 = arith.constant dense<0.000000e+00> : vector<2x128xf32>
    %106 = tpu.matmul %105, %3, %cst_47 {dimension_numbers = #tpu.dot_dimension_numbers<[1], [0], [0], [1], [0, 0, 1, 1], [], []>} : vector<2x32xbf16>, vector<32x128xbf16>, vector<2x128xf32> -> vector<2x128xf32>
    %107 = arith.addf %104, %106 : vector<2x128xf32>
    %108 = arith.negf %107 : vector<2x128xf32>
    %109 = math.exp %108 : vector<2x128xf32>
    %cst_48 = arith.constant 1.000000e+00 : f32
    %110 = vector.broadcast %cst_48 : f32 to vector<2x128xf32>
    %111 = arith.addf %110, %109 : vector<2x128xf32>
    %112 = arith.divf %110, %111 : vector<2x128xf32>
    %113 = math.tanh %107 : vector<2x128xf32>
    %114 = vector.extract_strided_slice %112 {offsets = [0, 0], sizes = [2, 32], strides = [1, 1]} : vector<2x128xf32> to vector<2x32xf32>
    %115 = vector.extract_strided_slice %112 {offsets = [0, 32], sizes = [2, 32], strides = [1, 1]} : vector<2x128xf32> to vector<2x32xf32>
    %116 = vector.extract_strided_slice %113 {offsets = [0, 64], sizes = [2, 32], strides = [1, 1]} : vector<2x128xf32> to vector<2x32xf32>
    %117 = vector.extract_strided_slice %112 {offsets = [0, 96], sizes = [2, 32], strides = [1, 1]} : vector<2x128xf32> to vector<2x32xf32>
    %118 = arith.mulf %115, %100 : vector<2x32xf32>
    %119 = arith.mulf %114, %116 : vector<2x32xf32>
    %120 = arith.addf %118, %119 : vector<2x32xf32>
    %121 = math.tanh %120 : vector<2x32xf32>
    %122 = arith.mulf %117, %121 : vector<2x32xf32>
    %c8_49 = arith.constant 8 : index
    %c0_50 = arith.constant 0 : index
    %123 = vector.load %arg14[%c8_49, %c0_50] : memref<16x32xf32, #tpu.memory_space<vmem>>, vector<2x32xf32>
    tpu.vector_store %arg14[%c8_49, %c0_50], %122 {strides = array<i32>} : memref<16x32xf32, #tpu.memory_space<vmem>>, vector<2x32xf32>,
    %c10 = arith.constant 10 : index
    %c0_51 = arith.constant 0 : index
    %124 = vector.load %arg13[%c10, %c0_51] : memref<16x128xf32, #tpu.memory_space<vmem>>, vector<2x128xf32>
    %125 = arith.truncf %122 : vector<2x32xf32> to vector<2x32xbf16>
    %cst_52 = arith.constant dense<0.000000e+00> : vector<2x128xf32>
    %126 = tpu.matmul %125, %3, %cst_52 {dimension_numbers = #tpu.dot_dimension_numbers<[1], [0], [0], [1], [0, 0, 1, 1], [], []>} : vector<2x32xbf16>, vector<32x128xbf16>, vector<2x128xf32> -> vector<2x128xf32>
    %127 = arith.addf %124, %126 : vector<2x128xf32>
    %128 = arith.negf %127 : vector<2x128xf32>
    %129 = math.exp %128 : vector<2x128xf32>
    %cst_53 = arith.constant 1.000000e+00 : f32
    %130 = vector.broadcast %cst_53 : f32 to vector<2x128xf32>
    %131 = arith.addf %130, %129 : vector<2x128xf32>
    %132 = arith.divf %130, %131 : vector<2x128xf32>
    %133 = math.tanh %127 : vector<2x128xf32>
    %134 = vector.extract_strided_slice %132 {offsets = [0, 0], sizes = [2, 32], strides = [1, 1]} : vector<2x128xf32> to vector<2x32xf32>
    %135 = vector.extract_strided_slice %132 {offsets = [0, 32], sizes = [2, 32], strides = [1, 1]} : vector<2x128xf32> to vector<2x32xf32>
    %136 = vector.extract_strided_slice %133 {offsets = [0, 64], sizes = [2, 32], strides = [1, 1]} : vector<2x128xf32> to vector<2x32xf32>
    %137 = vector.extract_strided_slice %132 {offsets = [0, 96], sizes = [2, 32], strides = [1, 1]} : vector<2x128xf32> to vector<2x32xf32>
    %138 = arith.mulf %135, %120 : vector<2x32xf32>
    %139 = arith.mulf %134, %136 : vector<2x32xf32>
    %140 = arith.addf %138, %139 : vector<2x32xf32>
    %141 = math.tanh %140 : vector<2x32xf32>
    %142 = arith.mulf %137, %141 : vector<2x32xf32>
    %c10_54 = arith.constant 10 : index
    %c0_55 = arith.constant 0 : index
    %143 = vector.load %arg14[%c10_54, %c0_55] : memref<16x32xf32, #tpu.memory_space<vmem>>, vector<2x32xf32>
    tpu.vector_store %arg14[%c10_54, %c0_55], %142 {strides = array<i32>} : memref<16x32xf32, #tpu.memory_space<vmem>>, vector<2x32xf32>,
    %c12 = arith.constant 12 : index
    %c0_56 = arith.constant 0 : index
    %144 = vector.load %arg13[%c12, %c0_56] : memref<16x128xf32, #tpu.memory_space<vmem>>, vector<2x128xf32>
    %145 = arith.truncf %142 : vector<2x32xf32> to vector<2x32xbf16>
    %cst_57 = arith.constant dense<0.000000e+00> : vector<2x128xf32>
    %146 = tpu.matmul %145, %3, %cst_57 {dimension_numbers = #tpu.dot_dimension_numbers<[1], [0], [0], [1], [0, 0, 1, 1], [], []>} : vector<2x32xbf16>, vector<32x128xbf16>, vector<2x128xf32> -> vector<2x128xf32>
    %147 = arith.addf %144, %146 : vector<2x128xf32>
    %148 = arith.negf %147 : vector<2x128xf32>
    %149 = math.exp %148 : vector<2x128xf32>
    %cst_58 = arith.constant 1.000000e+00 : f32
    %150 = vector.broadcast %cst_58 : f32 to vector<2x128xf32>
    %151 = arith.addf %150, %149 : vector<2x128xf32>
    %152 = arith.divf %150, %151 : vector<2x128xf32>
    %153 = math.tanh %147 : vector<2x128xf32>
    %154 = vector.extract_strided_slice %152 {offsets = [0, 0], sizes = [2, 32], strides = [1, 1]} : vector<2x128xf32> to vector<2x32xf32>
    %155 = vector.extract_strided_slice %152 {offsets = [0, 32], sizes = [2, 32], strides = [1, 1]} : vector<2x128xf32> to vector<2x32xf32>
    %156 = vector.extract_strided_slice %153 {offsets = [0, 64], sizes = [2, 32], strides = [1, 1]} : vector<2x128xf32> to vector<2x32xf32>
    %157 = vector.extract_strided_slice %152 {offsets = [0, 96], sizes = [2, 32], strides = [1, 1]} : vector<2x128xf32> to vector<2x32xf32>
    %158 = arith.mulf %155, %140 : vector<2x32xf32>
    %159 = arith.mulf %154, %156 : vector<2x32xf32>
    %160 = arith.addf %158, %159 : vector<2x32xf32>
    %161 = math.tanh %160 : vector<2x32xf32>
    %162 = arith.mulf %157, %161 : vector<2x32xf32>
    %c12_59 = arith.constant 12 : index
    %c0_60 = arith.constant 0 : index
    %163 = vector.load %arg14[%c12_59, %c0_60] : memref<16x32xf32, #tpu.memory_space<vmem>>, vector<2x32xf32>
    tpu.vector_store %arg14[%c12_59, %c0_60], %162 {strides = array<i32>} : memref<16x32xf32, #tpu.memory_space<vmem>>, vector<2x32xf32>,
    %c14 = arith.constant 14 : index
    %c0_61 = arith.constant 0 : index
    %164 = vector.load %arg13[%c14, %c0_61] : memref<16x128xf32, #tpu.memory_space<vmem>>, vector<2x128xf32>
    %165 = arith.truncf %162 : vector<2x32xf32> to vector<2x32xbf16>
    %cst_62 = arith.constant dense<0.000000e+00> : vector<2x128xf32>
    %166 = tpu.matmul %165, %3, %cst_62 {dimension_numbers = #tpu.dot_dimension_numbers<[1], [0], [0], [1], [0, 0, 1, 1], [], []>} : vector<2x32xbf16>, vector<32x128xbf16>, vector<2x128xf32> -> vector<2x128xf32>
    %167 = arith.addf %164, %166 : vector<2x128xf32>
    %168 = arith.negf %167 : vector<2x128xf32>
    %169 = math.exp %168 : vector<2x128xf32>
    %cst_63 = arith.constant 1.000000e+00 : f32
    %170 = vector.broadcast %cst_63 : f32 to vector<2x128xf32>
    %171 = arith.addf %170, %169 : vector<2x128xf32>
    %172 = arith.divf %170, %171 : vector<2x128xf32>
    %173 = math.tanh %167 : vector<2x128xf32>
    %174 = vector.extract_strided_slice %172 {offsets = [0, 0], sizes = [2, 32], strides = [1, 1]} : vector<2x128xf32> to vector<2x32xf32>
    %175 = vector.extract_strided_slice %172 {offsets = [0, 32], sizes = [2, 32], strides = [1, 1]} : vector<2x128xf32> to vector<2x32xf32>
    %176 = vector.extract_strided_slice %173 {offsets = [0, 64], sizes = [2, 32], strides = [1, 1]} : vector<2x128xf32> to vector<2x32xf32>
    %177 = vector.extract_strided_slice %172 {offsets = [0, 96], sizes = [2, 32], strides = [1, 1]} : vector<2x128xf32> to vector<2x32xf32>
    %178 = arith.mulf %175, %160 : vector<2x32xf32>
    %179 = arith.mulf %174, %176 : vector<2x32xf32>
    %180 = arith.addf %178, %179 : vector<2x32xf32>
    %181 = math.tanh %180 : vector<2x32xf32>
    %182 = arith.mulf %177, %181 : vector<2x32xf32>
    %c14_64 = arith.constant 14 : index
    %c0_65 = arith.constant 0 : index
    %183 = vector.load %arg14[%c14_64, %c0_65] : memref<16x32xf32, #tpu.memory_space<vmem>>, vector<2x32xf32>
    tpu.vector_store %arg14[%c14_64, %c0_65], %182 {strides = array<i32>} : memref<16x32xf32, #tpu.memory_space<vmem>>, vector<2x32xf32>,
    %c0_66 = arith.constant 0 : index
    %c0_67 = arith.constant 0 : index
    %184 = vector.load %arg14[%c0_66, %c0_67] : memref<16x32xf32, #tpu.memory_space<vmem>>, vector<16x32xf32>
    %185 = arith.truncf %184 : vector<16x32xf32> to vector<16x32xbf16>
    %cst_68 = arith.constant dense<0.000000e+00> : vector<16x16xf32>
    %186 = tpu.matmul %185, %9, %cst_68 {dimension_numbers = #tpu.dot_dimension_numbers<[1], [0], [0], [1], [0, 0, 1, 1], [], []>} : vector<16x32xbf16>, vector<32x16xbf16>, vector<16x16xf32> -> vector<16x16xf32>
    %187 = vector.broadcast %14 : vector<1x16xf32> to vector<16x16xf32>
    %188 = arith.addf %186, %187 : vector<16x16xf32>
    %189 = arith.truncf %188 : vector<16x16xf32> to vector<16x16xbf16>
    %cst_69 = arith.constant dense<0.000000e+00> : vector<16x128xf32>
    %190 = tpu.matmul %189, %5, %cst_69 {dimension_numbers = #tpu.dot_dimension_numbers<[1], [0], [0], [1], [0, 0, 1, 1], [], []>} : vector<16x16xbf16>, vector<16x128xbf16>, vector<16x128xf32> -> vector<16x128xf32>
    %191 = vector.broadcast %13 : vector<1x128xf32> to vector<16x128xf32>
    %192 = arith.addf %190, %191 : vector<16x128xf32>
    %c0_70 = arith.constant 0 : index
    %c0_71 = arith.constant 0 : index
    %193 = vector.load %arg13[%c0_70, %c0_71] : memref<16x128xf32, #tpu.memory_space<vmem>>, vector<16x128xf32>
    tpu.vector_store %arg13[%c0_70, %c0_71], %192 {strides = array<i32>} : memref<16x128xf32, #tpu.memory_space<vmem>>, vector<16x128xf32>,
    %c0_72 = arith.constant 0 : index
    %c0_73 = arith.constant 0 : index
    %194 = vector.load %arg13[%c0_72, %c0_73] : memref<16x128xf32, #tpu.memory_space<vmem>>, vector<2x128xf32>
    %195 = arith.truncf %16 : vector<2x32xf32> to vector<2x32xbf16>
    %cst_74 = arith.constant dense<0.000000e+00> : vector<2x128xf32>
    %196 = tpu.matmul %195, %7, %cst_74 {dimension_numbers = #tpu.dot_dimension_numbers<[1], [0], [0], [1], [0, 0, 1, 1], [], []>} : vector<2x32xbf16>, vector<32x128xbf16>, vector<2x128xf32> -> vector<2x128xf32>
    %197 = arith.addf %194, %196 : vector<2x128xf32>
    %198 = arith.negf %197 : vector<2x128xf32>
    %199 = math.exp %198 : vector<2x128xf32>
    %cst_75 = arith.constant 1.000000e+00 : f32
    %200 = vector.broadcast %cst_75 : f32 to vector<2x128xf32>
    %201 = arith.addf %200, %199 : vector<2x128xf32>
    %202 = arith.divf %200, %201 : vector<2x128xf32>
    %203 = math.tanh %197 : vector<2x128xf32>
    %204 = vector.extract_strided_slice %202 {offsets = [0, 0], sizes = [2, 32], strides = [1, 1]} : vector<2x128xf32> to vector<2x32xf32>
    %205 = vector.extract_strided_slice %202 {offsets = [0, 32], sizes = [2, 32], strides = [1, 1]} : vector<2x128xf32> to vector<2x32xf32>
    %206 = vector.extract_strided_slice %203 {offsets = [0, 64], sizes = [2, 32], strides = [1, 1]} : vector<2x128xf32> to vector<2x32xf32>
    %207 = vector.extract_strided_slice %202 {offsets = [0, 96], sizes = [2, 32], strides = [1, 1]} : vector<2x128xf32> to vector<2x32xf32>
    %208 = arith.mulf %205, %16 : vector<2x32xf32>
    %209 = arith.mulf %204, %206 : vector<2x32xf32>
    %210 = arith.addf %208, %209 : vector<2x32xf32>
    %211 = math.tanh %210 : vector<2x32xf32>
    %212 = arith.mulf %207, %211 : vector<2x32xf32>
    %c0_76 = arith.constant 0 : index
    %c0_77 = arith.constant 0 : index
    %213 = vector.load %arg14[%c0_76, %c0_77] : memref<16x32xf32, #tpu.memory_space<vmem>>, vector<2x32xf32>
    tpu.vector_store %arg14[%c0_76, %c0_77], %212 {strides = array<i32>} : memref<16x32xf32, #tpu.memory_space<vmem>>, vector<2x32xf32>,
    %c2_78 = arith.constant 2 : index
    %c0_79 = arith.constant 0 : index
    %214 = vector.load %arg13[%c2_78, %c0_79] : memref<16x128xf32, #tpu.memory_space<vmem>>, vector<2x128xf32>
    %215 = arith.truncf %212 : vector<2x32xf32> to vector<2x32xbf16>
    %cst_80 = arith.constant dense<0.000000e+00> : vector<2x128xf32>
    %216 = tpu.matmul %215, %7, %cst_80 {dimension_numbers = #tpu.dot_dimension_numbers<[1], [0], [0], [1], [0, 0, 1, 1], [], []>} : vector<2x32xbf16>, vector<32x128xbf16>, vector<2x128xf32> -> vector<2x128xf32>
    %217 = arith.addf %214, %216 : vector<2x128xf32>
    %218 = arith.negf %217 : vector<2x128xf32>
    %219 = math.exp %218 : vector<2x128xf32>
    %cst_81 = arith.constant 1.000000e+00 : f32
    %220 = vector.broadcast %cst_81 : f32 to vector<2x128xf32>
    %221 = arith.addf %220, %219 : vector<2x128xf32>
    %222 = arith.divf %220, %221 : vector<2x128xf32>
    %223 = math.tanh %217 : vector<2x128xf32>
    %224 = vector.extract_strided_slice %222 {offsets = [0, 0], sizes = [2, 32], strides = [1, 1]} : vector<2x128xf32> to vector<2x32xf32>
    %225 = vector.extract_strided_slice %222 {offsets = [0, 32], sizes = [2, 32], strides = [1, 1]} : vector<2x128xf32> to vector<2x32xf32>
    %226 = vector.extract_strided_slice %223 {offsets = [0, 64], sizes = [2, 32], strides = [1, 1]} : vector<2x128xf32> to vector<2x32xf32>
    %227 = vector.extract_strided_slice %222 {offsets = [0, 96], sizes = [2, 32], strides = [1, 1]} : vector<2x128xf32> to vector<2x32xf32>
    %228 = arith.mulf %225, %210 : vector<2x32xf32>
    %229 = arith.mulf %224, %226 : vector<2x32xf32>
    %230 = arith.addf %228, %229 : vector<2x32xf32>
    %231 = math.tanh %230 : vector<2x32xf32>
    %232 = arith.mulf %227, %231 : vector<2x32xf32>
    %c2_82 = arith.constant 2 : index
    %c0_83 = arith.constant 0 : index
    %233 = vector.load %arg14[%c2_82, %c0_83] : memref<16x32xf32, #tpu.memory_space<vmem>>, vector<2x32xf32>
    tpu.vector_store %arg14[%c2_82, %c0_83], %232 {strides = array<i32>} : memref<16x32xf32, #tpu.memory_space<vmem>>, vector<2x32xf32>,
    %c4_84 = arith.constant 4 : index
    %c0_85 = arith.constant 0 : index
    %234 = vector.load %arg13[%c4_84, %c0_85] : memref<16x128xf32, #tpu.memory_space<vmem>>, vector<2x128xf32>
    %235 = arith.truncf %232 : vector<2x32xf32> to vector<2x32xbf16>
    %cst_86 = arith.constant dense<0.000000e+00> : vector<2x128xf32>
    %236 = tpu.matmul %235, %7, %cst_86 {dimension_numbers = #tpu.dot_dimension_numbers<[1], [0], [0], [1], [0, 0, 1, 1], [], []>} : vector<2x32xbf16>, vector<32x128xbf16>, vector<2x128xf32> -> vector<2x128xf32>
    %237 = arith.addf %234, %236 : vector<2x128xf32>
    %238 = arith.negf %237 : vector<2x128xf32>
    %239 = math.exp %238 : vector<2x128xf32>
    %cst_87 = arith.constant 1.000000e+00 : f32
    %240 = vector.broadcast %cst_87 : f32 to vector<2x128xf32>
    %241 = arith.addf %240, %239 : vector<2x128xf32>
    %242 = arith.divf %240, %241 : vector<2x128xf32>
    %243 = math.tanh %237 : vector<2x128xf32>
    %244 = vector.extract_strided_slice %242 {offsets = [0, 0], sizes = [2, 32], strides = [1, 1]} : vector<2x128xf32> to vector<2x32xf32>
    %245 = vector.extract_strided_slice %242 {offsets = [0, 32], sizes = [2, 32], strides = [1, 1]} : vector<2x128xf32> to vector<2x32xf32>
    %246 = vector.extract_strided_slice %243 {offsets = [0, 64], sizes = [2, 32], strides = [1, 1]} : vector<2x128xf32> to vector<2x32xf32>
    %247 = vector.extract_strided_slice %242 {offsets = [0, 96], sizes = [2, 32], strides = [1, 1]} : vector<2x128xf32> to vector<2x32xf32>
    %248 = arith.mulf %245, %230 : vector<2x32xf32>
    %249 = arith.mulf %244, %246 : vector<2x32xf32>
    %250 = arith.addf %248, %249 : vector<2x32xf32>
    %251 = math.tanh %250 : vector<2x32xf32>
    %252 = arith.mulf %247, %251 : vector<2x32xf32>
    %c4_88 = arith.constant 4 : index
    %c0_89 = arith.constant 0 : index
    %253 = vector.load %arg14[%c4_88, %c0_89] : memref<16x32xf32, #tpu.memory_space<vmem>>, vector<2x32xf32>
    tpu.vector_store %arg14[%c4_88, %c0_89], %252 {strides = array<i32>} : memref<16x32xf32, #tpu.memory_space<vmem>>, vector<2x32xf32>,
    %c6_90 = arith.constant 6 : index
    %c0_91 = arith.constant 0 : index
    %254 = vector.load %arg13[%c6_90, %c0_91] : memref<16x128xf32, #tpu.memory_space<vmem>>, vector<2x128xf32>
    %255 = arith.truncf %252 : vector<2x32xf32> to vector<2x32xbf16>
    %cst_92 = arith.constant dense<0.000000e+00> : vector<2x128xf32>
    %256 = tpu.matmul %255, %7, %cst_92 {dimension_numbers = #tpu.dot_dimension_numbers<[1], [0], [0], [1], [0, 0, 1, 1], [], []>} : vector<2x32xbf16>, vector<32x128xbf16>, vector<2x128xf32> -> vector<2x128xf32>
    %257 = arith.addf %254, %256 : vector<2x128xf32>
    %258 = arith.negf %257 : vector<2x128xf32>
    %259 = math.exp %258 : vector<2x128xf32>
    %cst_93 = arith.constant 1.000000e+00 : f32
    %260 = vector.broadcast %cst_93 : f32 to vector<2x128xf32>
    %261 = arith.addf %260, %259 : vector<2x128xf32>
    %262 = arith.divf %260, %261 : vector<2x128xf32>
    %263 = math.tanh %257 : vector<2x128xf32>
    %264 = vector.extract_strided_slice %262 {offsets = [0, 0], sizes = [2, 32], strides = [1, 1]} : vector<2x128xf32> to vector<2x32xf32>
    %265 = vector.extract_strided_slice %262 {offsets = [0, 32], sizes = [2, 32], strides = [1, 1]} : vector<2x128xf32> to vector<2x32xf32>
    %266 = vector.extract_strided_slice %263 {offsets = [0, 64], sizes = [2, 32], strides = [1, 1]} : vector<2x128xf32> to vector<2x32xf32>
    %267 = vector.extract_strided_slice %262 {offsets = [0, 96], sizes = [2, 32], strides = [1, 1]} : vector<2x128xf32> to vector<2x32xf32>
    %268 = arith.mulf %265, %250 : vector<2x32xf32>
    %269 = arith.mulf %264, %266 : vector<2x32xf32>
    %270 = arith.addf %268, %269 : vector<2x32xf32>
    %271 = math.tanh %270 : vector<2x32xf32>
    %272 = arith.mulf %267, %271 : vector<2x32xf32>
    %c6_94 = arith.constant 6 : index
    %c0_95 = arith.constant 0 : index
    %273 = vector.load %arg14[%c6_94, %c0_95] : memref<16x32xf32, #tpu.memory_space<vmem>>, vector<2x32xf32>
    tpu.vector_store %arg14[%c6_94, %c0_95], %272 {strides = array<i32>} : memref<16x32xf32, #tpu.memory_space<vmem>>, vector<2x32xf32>,
    %c8_96 = arith.constant 8 : index
    %c0_97 = arith.constant 0 : index
    %274 = vector.load %arg13[%c8_96, %c0_97] : memref<16x128xf32, #tpu.memory_space<vmem>>, vector<2x128xf32>
    %275 = arith.truncf %272 : vector<2x32xf32> to vector<2x32xbf16>
    %cst_98 = arith.constant dense<0.000000e+00> : vector<2x128xf32>
    %276 = tpu.matmul %275, %7, %cst_98 {dimension_numbers = #tpu.dot_dimension_numbers<[1], [0], [0], [1], [0, 0, 1, 1], [], []>} : vector<2x32xbf16>, vector<32x128xbf16>, vector<2x128xf32> -> vector<2x128xf32>
    %277 = arith.addf %274, %276 : vector<2x128xf32>
    %278 = arith.negf %277 : vector<2x128xf32>
    %279 = math.exp %278 : vector<2x128xf32>
    %cst_99 = arith.constant 1.000000e+00 : f32
    %280 = vector.broadcast %cst_99 : f32 to vector<2x128xf32>
    %281 = arith.addf %280, %279 : vector<2x128xf32>
    %282 = arith.divf %280, %281 : vector<2x128xf32>
    %283 = math.tanh %277 : vector<2x128xf32>
    %284 = vector.extract_strided_slice %282 {offsets = [0, 0], sizes = [2, 32], strides = [1, 1]} : vector<2x128xf32> to vector<2x32xf32>
    %285 = vector.extract_strided_slice %282 {offsets = [0, 32], sizes = [2, 32], strides = [1, 1]} : vector<2x128xf32> to vector<2x32xf32>
    %286 = vector.extract_strided_slice %283 {offsets = [0, 64], sizes = [2, 32], strides = [1, 1]} : vector<2x128xf32> to vector<2x32xf32>
    %287 = vector.extract_strided_slice %282 {offsets = [0, 96], sizes = [2, 32], strides = [1, 1]} : vector<2x128xf32> to vector<2x32xf32>
    %288 = arith.mulf %285, %270 : vector<2x32xf32>
    %289 = arith.mulf %284, %286 : vector<2x32xf32>
    %290 = arith.addf %288, %289 : vector<2x32xf32>
    %291 = math.tanh %290 : vector<2x32xf32>
    %292 = arith.mulf %287, %291 : vector<2x32xf32>
    %c8_100 = arith.constant 8 : index
    %c0_101 = arith.constant 0 : index
    %293 = vector.load %arg14[%c8_100, %c0_101] : memref<16x32xf32, #tpu.memory_space<vmem>>, vector<2x32xf32>
    tpu.vector_store %arg14[%c8_100, %c0_101], %292 {strides = array<i32>} : memref<16x32xf32, #tpu.memory_space<vmem>>, vector<2x32xf32>,
    %c10_102 = arith.constant 10 : index
    %c0_103 = arith.constant 0 : index
    %294 = vector.load %arg13[%c10_102, %c0_103] : memref<16x128xf32, #tpu.memory_space<vmem>>, vector<2x128xf32>
    %295 = arith.truncf %292 : vector<2x32xf32> to vector<2x32xbf16>
    %cst_104 = arith.constant dense<0.000000e+00> : vector<2x128xf32>
    %296 = tpu.matmul %295, %7, %cst_104 {dimension_numbers = #tpu.dot_dimension_numbers<[1], [0], [0], [1], [0, 0, 1, 1], [], []>} : vector<2x32xbf16>, vector<32x128xbf16>, vector<2x128xf32> -> vector<2x128xf32>
    %297 = arith.addf %294, %296 : vector<2x128xf32>
    %298 = arith.negf %297 : vector<2x128xf32>
    %299 = math.exp %298 : vector<2x128xf32>
    %cst_105 = arith.constant 1.000000e+00 : f32
    %300 = vector.broadcast %cst_105 : f32 to vector<2x128xf32>
    %301 = arith.addf %300, %299 : vector<2x128xf32>
    %302 = arith.divf %300, %301 : vector<2x128xf32>
    %303 = math.tanh %297 : vector<2x128xf32>
    %304 = vector.extract_strided_slice %302 {offsets = [0, 0], sizes = [2, 32], strides = [1, 1]} : vector<2x128xf32> to vector<2x32xf32>
    %305 = vector.extract_strided_slice %302 {offsets = [0, 32], sizes = [2, 32], strides = [1, 1]} : vector<2x128xf32> to vector<2x32xf32>
    %306 = vector.extract_strided_slice %303 {offsets = [0, 64], sizes = [2, 32], strides = [1, 1]} : vector<2x128xf32> to vector<2x32xf32>
    %307 = vector.extract_strided_slice %302 {offsets = [0, 96], sizes = [2, 32], strides = [1, 1]} : vector<2x128xf32> to vector<2x32xf32>
    %308 = arith.mulf %305, %290 : vector<2x32xf32>
    %309 = arith.mulf %304, %306 : vector<2x32xf32>
    %310 = arith.addf %308, %309 : vector<2x32xf32>
    %311 = math.tanh %310 : vector<2x32xf32>
    %312 = arith.mulf %307, %311 : vector<2x32xf32>
    %c10_106 = arith.constant 10 : index
    %c0_107 = arith.constant 0 : index
    %313 = vector.load %arg14[%c10_106, %c0_107] : memref<16x32xf32, #tpu.memory_space<vmem>>, vector<2x32xf32>
    tpu.vector_store %arg14[%c10_106, %c0_107], %312 {strides = array<i32>} : memref<16x32xf32, #tpu.memory_space<vmem>>, vector<2x32xf32>,
    %c12_108 = arith.constant 12 : index
    %c0_109 = arith.constant 0 : index
    %314 = vector.load %arg13[%c12_108, %c0_109] : memref<16x128xf32, #tpu.memory_space<vmem>>, vector<2x128xf32>
    %315 = arith.truncf %312 : vector<2x32xf32> to vector<2x32xbf16>
    %cst_110 = arith.constant dense<0.000000e+00> : vector<2x128xf32>
    %316 = tpu.matmul %315, %7, %cst_110 {dimension_numbers = #tpu.dot_dimension_numbers<[1], [0], [0], [1], [0, 0, 1, 1], [], []>} : vector<2x32xbf16>, vector<32x128xbf16>, vector<2x128xf32> -> vector<2x128xf32>
    %317 = arith.addf %314, %316 : vector<2x128xf32>
    %318 = arith.negf %317 : vector<2x128xf32>
    %319 = math.exp %318 : vector<2x128xf32>
    %cst_111 = arith.constant 1.000000e+00 : f32
    %320 = vector.broadcast %cst_111 : f32 to vector<2x128xf32>
    %321 = arith.addf %320, %319 : vector<2x128xf32>
    %322 = arith.divf %320, %321 : vector<2x128xf32>
    %323 = math.tanh %317 : vector<2x128xf32>
    %324 = vector.extract_strided_slice %322 {offsets = [0, 0], sizes = [2, 32], strides = [1, 1]} : vector<2x128xf32> to vector<2x32xf32>
    %325 = vector.extract_strided_slice %322 {offsets = [0, 32], sizes = [2, 32], strides = [1, 1]} : vector<2x128xf32> to vector<2x32xf32>
    %326 = vector.extract_strided_slice %323 {offsets = [0, 64], sizes = [2, 32], strides = [1, 1]} : vector<2x128xf32> to vector<2x32xf32>
    %327 = vector.extract_strided_slice %322 {offsets = [0, 96], sizes = [2, 32], strides = [1, 1]} : vector<2x128xf32> to vector<2x32xf32>
    %328 = arith.mulf %325, %310 : vector<2x32xf32>
    %329 = arith.mulf %324, %326 : vector<2x32xf32>
    %330 = arith.addf %328, %329 : vector<2x32xf32>
    %331 = math.tanh %330 : vector<2x32xf32>
    %332 = arith.mulf %327, %331 : vector<2x32xf32>
    %c12_112 = arith.constant 12 : index
    %c0_113 = arith.constant 0 : index
    %333 = vector.load %arg14[%c12_112, %c0_113] : memref<16x32xf32, #tpu.memory_space<vmem>>, vector<2x32xf32>
    tpu.vector_store %arg14[%c12_112, %c0_113], %332 {strides = array<i32>} : memref<16x32xf32, #tpu.memory_space<vmem>>, vector<2x32xf32>,
    %c14_114 = arith.constant 14 : index
    %c0_115 = arith.constant 0 : index
    %334 = vector.load %arg13[%c14_114, %c0_115] : memref<16x128xf32, #tpu.memory_space<vmem>>, vector<2x128xf32>
    %335 = arith.truncf %332 : vector<2x32xf32> to vector<2x32xbf16>
    %cst_116 = arith.constant dense<0.000000e+00> : vector<2x128xf32>
    %336 = tpu.matmul %335, %7, %cst_116 {dimension_numbers = #tpu.dot_dimension_numbers<[1], [0], [0], [1], [0, 0, 1, 1], [], []>} : vector<2x32xbf16>, vector<32x128xbf16>, vector<2x128xf32> -> vector<2x128xf32>
    %337 = arith.addf %334, %336 : vector<2x128xf32>
    %338 = arith.negf %337 : vector<2x128xf32>
    %339 = math.exp %338 : vector<2x128xf32>
    %cst_117 = arith.constant 1.000000e+00 : f32
    %340 = vector.broadcast %cst_117 : f32 to vector<2x128xf32>
    %341 = arith.addf %340, %339 : vector<2x128xf32>
    %342 = arith.divf %340, %341 : vector<2x128xf32>
    %343 = math.tanh %337 : vector<2x128xf32>
    %344 = vector.extract_strided_slice %342 {offsets = [0, 0], sizes = [2, 32], strides = [1, 1]} : vector<2x128xf32> to vector<2x32xf32>
    %345 = vector.extract_strided_slice %342 {offsets = [0, 32], sizes = [2, 32], strides = [1, 1]} : vector<2x128xf32> to vector<2x32xf32>
    %346 = vector.extract_strided_slice %343 {offsets = [0, 64], sizes = [2, 32], strides = [1, 1]} : vector<2x128xf32> to vector<2x32xf32>
    %347 = vector.extract_strided_slice %342 {offsets = [0, 96], sizes = [2, 32], strides = [1, 1]} : vector<2x128xf32> to vector<2x32xf32>
    %348 = arith.mulf %345, %330 : vector<2x32xf32>
    %349 = arith.mulf %344, %346 : vector<2x32xf32>
    %350 = arith.addf %348, %349 : vector<2x32xf32>
    %351 = math.tanh %350 : vector<2x32xf32>
    %352 = arith.mulf %347, %351 : vector<2x32xf32>
    %c14_118 = arith.constant 14 : index
    %c0_119 = arith.constant 0 : index
    %353 = vector.load %arg14[%c14_118, %c0_119] : memref<16x32xf32, #tpu.memory_space<vmem>>, vector<2x32xf32>
    tpu.vector_store %arg14[%c14_118, %c0_119], %352 {strides = array<i32>} : memref<16x32xf32, #tpu.memory_space<vmem>>, vector<2x32xf32>,
    %c0_120 = arith.constant 0 : index
    %c0_121 = arith.constant 0 : index
    %354 = vector.load %arg14[%c0_120, %c0_121] : memref<16x32xf32, #tpu.memory_space<vmem>>, vector<16x32xf32>
    %355 = arith.truncf %354 : vector<16x32xf32> to vector<16x32xbf16>
    %cst_122 = arith.constant dense<0.000000e+00> : vector<16x4xf32>
    %356 = tpu.matmul %355, %11, %cst_122 {dimension_numbers = #tpu.dot_dimension_numbers<[1], [0], [0], [1], [0, 0, 1, 1], [], []>} : vector<16x32xbf16>, vector<32x4xbf16>, vector<16x4xf32> -> vector<16x4xf32>
    %357 = vector.broadcast %15 : vector<1x4xf32> to vector<16x4xf32>
    %358 = arith.addf %356, %357 : vector<16x4xf32>
    %c0_123 = arith.constant 0 : index
    %c0_124 = arith.constant 0 : index
    %c0_125 = arith.constant 0 : index
    %359 = vector.load %arg12[%c0_123, %c0_124, %c0_125] : memref<1x16x4xf32, #tpu.memory_space<vmem>>, vector<1x16x4xf32>
    %360 = vector.shape_cast %359 : vector<1x16x4xf32> to vector<16x4xf32>
    %361 = vector.shape_cast %358 : vector<16x4xf32> to vector<1x16x4xf32>
    tpu.vector_store %arg12[%c0_123, %c0_124, %c0_125], %361 {strides = array<i32>} : memref<1x16x4xf32, #tpu.memory_space<vmem>>, vector<1x16x4xf32>,
    return
  }
  func.func @transform_0(%arg0: i32) -> (i32, i32, i32) {
    %c0_i32 = arith.constant 0 : i32
    %c0_i32_0 = arith.constant 0 : i32
    %c0_i32_1 = arith.constant 0 : i32
    return %arg0, %c0_i32, %c0_i32_0 : i32, i32, i32
  }
  func.func @transform_1(%arg0: i32) -> (i32, i32) {
    %c0_i32 = arith.constant 0 : i32
    %c0_i32_0 = arith.constant 0 : i32
    %c0_i32_1 = arith.constant 0 : i32
    return %c0_i32, %c0_i32_0 : i32, i32
  }
  func.func @transform_2(%arg0: i32) -> (i32, i32) {
    %c0_i32 = arith.constant 0 : i32
    %c0_i32_0 = arith.constant 0 : i32
    %c0_i32_1 = arith.constant 0 : i32
    return %c0_i32, %c0_i32_0 : i32, i32
  }
  func.func @transform_3(%arg0: i32) -> (i32, i32) {
    %c0_i32 = arith.constant 0 : i32
    %c0_i32_0 = arith.constant 0 : i32
    %c0_i32_1 = arith.constant 0 : i32
    return %c0_i32, %c0_i32_0 : i32, i32
  }
  func.func @transform_4(%arg0: i32) -> (i32, i32) {
    %c0_i32 = arith.constant 0 : i32
    %c0_i32_0 = arith.constant 0 : i32
    %c0_i32_1 = arith.constant 0 : i32
    return %c0_i32, %c0_i32_0 : i32, i32
  }
  func.func @transform_5(%arg0: i32) -> (i32, i32) {
    %c0_i32 = arith.constant 0 : i32
    %c0_i32_0 = arith.constant 0 : i32
    %c0_i32_1 = arith.constant 0 : i32
    return %c0_i32, %c0_i32_0 : i32, i32
  }
  func.func @transform_6(%arg0: i32) -> (i32, i32) {
    %c0_i32 = arith.constant 0 : i32
    %c0_i32_0 = arith.constant 0 : i32
    %c0_i32_1 = arith.constant 0 : i32
    return %c0_i32, %c0_i32_0 : i32, i32
  }
  func.func @transform_7(%arg0: i32) -> (i32, i32) {
    %c0_i32 = arith.constant 0 : i32
    %c0_i32_0 = arith.constant 0 : i32
    %c0_i32_1 = arith.constant 0 : i32
    return %c0_i32, %c0_i32_0 : i32, i32
  }
  func.func @transform_8(%arg0: i32) -> (i32, i32) {
    %c0_i32 = arith.constant 0 : i32
    %c0_i32_0 = arith.constant 0 : i32
    %c0_i32_1 = arith.constant 0 : i32
    return %c0_i32, %c0_i32_0 : i32, i32
  }
  func.func @transform_9(%arg0: i32) -> (i32, i32) {
    %c0_i32 = arith.constant 0 : i32
    %c0_i32_0 = arith.constant 0 : i32
    %c0_i32_1 = arith.constant 0 : i32
    return %c0_i32, %c0_i32_0 : i32, i32
  }
  func.func @transform_10(%arg0: i32) -> (i32, i32) {
    %c0_i32 = arith.constant 0 : i32
    %c0_i32_0 = arith.constant 0 : i32
    %c0_i32_1 = arith.constant 0 : i32
    return %c0_i32, %c0_i32_0 : i32, i32
  }
  func.func @transform_11(%arg0: i32) -> (i32, i32, i32) {
    %c0_i32 = arith.constant 0 : i32
    %c0_i32_0 = arith.constant 0 : i32
    %c0_i32_1 = arith.constant 0 : i32
    return %arg0, %c0_i32, %c0_i32_0 : i32, i32, i32
  }
}

</mosaic_0001>

<bundles_post_ra>
// kernel: tpu_custom_call.1
= control target key start
LH: loop header
LB: loop body
LE: loop exit
PB: predicated region body
PF: predicated region fallthrough
CT: control target
= control target key end

     0   :  { %v1922_v0 = vmov 0.0   ;;  %vm85_vm0 = vcmask 1041408   ;;  %vm1923_vm1 = vmmov 0   ;;  %vm81_vm2 = vcmask 31744   ;;  %s1925_s30 = smov 64   ;;  %s2361_s1 = inlined_call_operand.vmem [shape: f32[4,128], index: 1, kind: input, shape index: {}]   ;;  %s2362_s2 = inlined_call_operand.vmem [shape: f32[32,128], index: 2, kind: input, shape index: {}]   ;;  %s2363_s0 = inlined_call_operand.vmem [shape: f32[1,16,4], index: 0, kind: input, shape index: {}]   ;;  %s2364_s3 = inlined_call_operand.vmem [shape: f32[1,128], index: 3, kind: input, shape index: {}]   ;;  %s2365_s4 = inlined_call_operand.vmem [shape: f32[32,16], index: 4, kind: input, shape index: {}]   ;;  %s2366_s6 = inlined_call_operand.vmem [shape: f32[16,128], index: 6, kind: input, shape index: {}]   ;;  %s2367_s7 = inlined_call_operand.vmem [shape: f32[32,128], index: 7, kind: input, shape index: {}]   ;;  %s2368_s5 = inlined_call_operand.vmem [shape: f32[1,16], index: 5, kind: input, shape index: {}]   ;;  %s2369_s8 = inlined_call_operand.vmem [shape: f32[1,128], index: 8, kind: input, shape index: {}]   ;;  %s2370_s9 = inlined_call_operand.vmem [shape: f32[32,4], index: 9, kind: input, shape index: {}]   ;;  %s2371_s10 = inlined_call_operand.vmem [shape: f32[1,4], index: 10, kind: input, shape index: {}]   ;;  %s2372_s11 = inlined_call_operand.vmem [shape: f32[1,16,4], index: 11, kind: output, shape index: {}]  }
   0x1   :  { %1633 = vmatprep.subr.bf16.mxu0 %v1922_v0  ;;  %1639 = vmatprep.subr.bf16.mxu1 %v1922_v0  ;;  %v39_v1 = vld [vmem:[%s2361_s1] sm:$0xf]  ;;  %v43_v2 = vld [vmem:[%s2362_s2 + $0x10] sm:$0xff]  ;;  %v44_v3 = vld [vmem:[%s2362_s2 + $0x18] sm:$0xff]  ;;  %v1924_v13 = vmov 0   ;;  %vm133_vm3 = vcmask 261120  }
   0x2   :  { %v40_v4 = vpack.c.bf16 %v39_v1, %v39_v1  ;;  %v1998_v5 = vpack.c.bf16 %v44_v3, %v43_v2  ;;  %1635 = vmatprep.mubr.msk.bf16.mxu0 %vm1923_vm1, %v1922_v0  ;;  %v72_v6 = vld [vmem:[%s2363_s0] sm:$0xff]  ;;  %v73_v7 = vld [vmem:[%s2363_s0 + $0x8] sm:$0xff]  ;;  %1643 = vmatprep.mubr.msk.bf16.mxu1 %vm1923_vm1, %v1922_v0  ;;  %vm206_vm4 = vcmask 254976   ;;  %vm814_vm5 = vcmask 130048  }
   0x3   :  { %v41_v8 = vld [vmem:[%s2362_s2] sm:$0xff]  ;;  %v42_v9 = vld [vmem:[%s2362_s2 + $0x8] sm:$0xff]  ;;  %v74_v11 = vpack.c.bf16 %v73_v7, %v72_v6 }
   0x4   :  { %v87_v10 = vsel %vm85_vm0, %v40_v4, 0  ;;  %1640 = vmatpush3.bf16.msra.mxu1 %v1998_v5  ;;  %v2017_v12 = vpack.c.bf16 %v42_v9, %v41_v8  ;;  %v1537_v14 = vld [vmem:[%s2364_s3] ss:$0 sm:$0xff]  ;;  %s1926_s3 = smov 32  }
   0x5   :  { %1634 = vmatpush3.bf16.msra.mxu0 %v87_v10  ;;  %1641 = vmatprep.subr.bf16.mxu1 %v1922_v0 }
   0x6   :  { %1647 = vmatprep.subr.bf16.mxu0 %v1922_v0 }
   0x8   :  { %1636 = vmatmul.mubr.msk.bf16.vlgmr.msra.gmra.mxu0 %vm81_vm2, %v74_v11  ;;  %1642 = vmatpush3.bf16.msra.mxu1 %v2017_v12 }
   0x9   :  { %1648 = vmatpush3.bf16.msra.mxu0 %v1998_v5  ;;  %1651 = vmatprep.mubr.msk.bf16.mxu0 %vm1923_vm1, %v1922_v0 }
   0xa   :  { %1649 = vmatprep.subr.bf16.mxu0 %v1922_v0  ;;  %1655 = vmatprep.subr.bf16.mxu1 %v1922_v0 }
   0xb   :  { %1644 = vmatmul.mubr.bf16.vlgmr.msra.gmra.mxu1 %v1924_v13 }
   0xc   :  { %1656 = vmatpush3.bf16.msra.mxu1 %v1998_v5  ;;  %1659 = vmatprep.mubr.msk.bf16.mxu1 %vm1923_vm1, %v1922_v0 }
   0xd   :  { %1650 = vmatpush3.bf16.msra.mxu0 %v2017_v12  ;;  %1657 = vmatprep.subr.bf16.mxu1 %v1922_v0 }
   0xe   :  { %1663 = vmatprep.subr.bf16.mxu0 %v1922_v0 }
  0x10   :  { %1658 = vmatpush3.bf16.msra.mxu1 %v2017_v12 }
  0x11   :  { %1671 = vmatprep.subr.bf16.mxu1 %v1922_v0 }
  0xc8   :  { %v123_v15 = vpop.f32.mrf.mxu0 }
  0xc9   :  { %v124_v16 = vadd.f32 %v1537_v14, %v123_v15 }
  0xca   :  { %v1637_v17 = vpop.f32.mrf.mxu0 }
  0xcb   :  { %130 = vst [vmem:[#allocation2] sm:$0xff] %v124_v16  ;;  %v171_v18 = vpop.f32.mrf.mxu1 }
  0xcc   :  { %v126_v19 = vpop.f32.mrf.mxu0 }
  0xcd   :  { %v127_v20 = vadd.f32 %v1537_v14, %v126_v19  ;;  %v1645_v21 = vpop.f32.mrf.mxu1 }
  0xce   :  { %v1638_v22 = vpop.f32.mrf.mxu0 }
  0xcf   :  { %131 = vst [vmem:[#allocation2 + $0x8] sm:$0xff] %v127_v20  ;;  %v174_v23 = vpop.f32.mrf.mxu1 }
  0xd1   :  { %v1646_v24 = vpop.f32.mrf.mxu1 }
  0xd2   :  { %v132_v25 = vld [vmem:[#allocation2] sm:$0x3]  ;;  %v208_v42 = vld [vmem:[#allocation2 + $0x2] sm:$0x3]  ;;  %v286_v63 = vld [vmem:[#allocation2 + $0x4] sm:$0x3] }
  0xd3   :  { %v177_v26 = vadd.f32 %v171_v18, %v132_v25  ;;  %v364_v24 = vld [vmem:[#allocation2 + $0x6] sm:$0x3] }
  0xd5   :  { %1794 = vtanh.f32 %v177_v26  ;;  %v1539_v28 = vmul.f32 -1.442695, %v177_v26 }
  0xd7   :  { %1796 = vpow2.f32 %v1539_v28 }
  0xe2   :  { %v1795_v27 = vpop.eup %1794 }
  0xe3   :  { %187 = vrot.lane.b32.xlu0 %v1795_v27, %s1925_s30 }
  0xe4   :  { %v1797_v29 = vpop.eup %1796 }
  0xe5   :  { %v181_v30 = vadd.f32 1.0, %v1797_v29 }
  0xe7   :  { %1798 = vrcp.f32 %v181_v30 }
  0xf4   :  { %v1799_v31 = vpop.eup %1798 }
  0xf5   :  { %v185_v34 = vmul.f32 0.0, %v1799_v31 }
 0x155   :  { %v188_v32 = vpop.permute.xlu0 %187 }
 0x156   :  { %v190_v33 = vmul.f32 %v1799_v31, %v188_v32 }
 0x158   :  { %192 = vrot.lane.b32.xlu0 %v190_v33, %s1926_s3 }
 0x1ca   :  { %v193_v35 = vpop.permute.xlu0 %192 }
 0x1cb   :  { %v195_v36 = vadd.f32 %v193_v35, %v185_v34 }
 0x1cd   :  { %1800 = vtanh.f32 %v195_v36 }
 0x1da   :  { %v1801_v37 = vpop.eup %1800 }
 0x1db   :  { %198 = vrot.lane.b32.xlu1 %v1801_v37, %s1925_s30 }
 0x24d   :  { %v199_v38 = vpop.permute.xlu1 %198 }
 0x24e   :  { %v2043_v39 = vmul.f32 %v1799_v31, %v199_v38 }
 0x250   :  { %v209_v40 = vpack.c.bf16 %v2043_v39, %v2043_v39 }
 0x252   :  { %211 = vrot.lane.b32.xlu1 %v209_v40, %s1926_s3 }
 0x2c4   :  { %v212_v41 = vpop.permute.xlu1 %211 }
 0x2c5   :  { %1652 = vmatmul.mubr.msk.bf16.vlgmr.msra.gmra.mxu0 %vm133_vm3, %v212_v41 }
 0x2c6   :  { %1664 = vmatpush3.bf16.msra.mxu0 %v1998_v5  ;;  %1667 = vmatprep.mubr.msk.bf16.mxu0 %vm1923_vm1, %v1922_v0 }
 0x2c7   :  { %1665 = vmatprep.subr.bf16.mxu0 %v1922_v0 }
 0x2ca   :  { %1666 = vmatpush3.bf16.msra.mxu0 %v2017_v12 }
 0x2cb   :  { %1679 = vmatprep.subr.bf16.mxu0 %v1922_v0 }
 0x385   :  { %v250_v43 = vpop.f32.mrf.mxu0 }
 0x386   :  { %v256_v44 = vadd.f32 %v250_v43, %v208_v42 }
 0x387   :  { %v1653_v45 = vpop.f32.mrf.mxu0 }
 0x388   :  { %1802 = vtanh.f32 %v256_v44  ;;  %v1541_v49 = vmul.f32 -1.442695, %v256_v44 }
 0x389   :  { %v253_v46 = vpop.f32.mrf.mxu0 }
 0x38a   :  { %1804 = vpow2.f32 %v1541_v49  ;;  %v442_v46 = vld [vmem:[#allocation2 + $0x8] sm:$0x3] }
 0x38b   :  { %v1654_v47 = vpop.f32.mrf.mxu0 }
 0x395   :  { %v1803_v48 = vpop.eup %1802 }
 0x396   :  { %266 = vrot.lane.b32.xlu0 %v1803_v48, %s1925_s30 }
 0x397   :  { %v1805_v50 = vpop.eup %1804 }
 0x398   :  { %v260_v51 = vadd.f32 1.0, %v1805_v50 }
 0x39a   :  { %1806 = vrcp.f32 %v260_v51 }
 0x3a7   :  { %v1807_v52 = vpop.eup %1806 }
 0x3a8   :  { %v264_v55 = vmul.f32 %v1807_v52, %v195_v36 }
 0x408   :  { %v267_v53 = vpop.permute.xlu0 %266 }
 0x409   :  { %v269_v54 = vmul.f32 %v1807_v52, %v267_v53 }
 0x40b   :  { %271 = vrot.lane.b32.xlu1 %v269_v54, %s1926_s3 }
 0x47d   :  { %v272_v56 = vpop.permute.xlu1 %271 }
 0x47e   :  { %v274_v57 = vadd.f32 %v272_v56, %v264_v55 }
 0x480   :  { %1808 = vtanh.f32 %v274_v57 }
 0x48d   :  { %v1809_v58 = vpop.eup %1808 }
 0x48e   :  { %277 = vrot.lane.b32.xlu0 %v1809_v58, %s1925_s30 }
 0x500   :  { %v278_v59 = vpop.permute.xlu0 %277 }
 0x501   :  { %v2058_v60 = vmul.f32 %v1807_v52, %v278_v59 }
 0x503   :  { %v287_v61 = vpack.c.bf16 %v2058_v60, %v2058_v60 }
 0x505   :  { %289 = vrot.lane.b32.xlu1 %v287_v61, %s1926_s3 }
 0x577   :  { %v290_v62 = vpop.permute.xlu1 %289 }
 0x578   :  { %1660 = vmatmul.mubr.msk.bf16.vlgmr.msra.gmra.mxu1 %vm133_vm3, %v290_v62 }
 0x579   :  { %1672 = vmatpush3.bf16.msra.mxu1 %v1998_v5  ;;  %1675 = vmatprep.mubr.msk.bf16.mxu1 %vm1923_vm1, %v1922_v0 }
 0x57a   :  { %1673 = vmatprep.subr.bf16.mxu1 %v1922_v0 }
 0x57d   :  { %1674 = vmatpush3.bf16.msra.mxu1 %v2017_v12 }
 0x57e   :  { %1687 = vmatprep.subr.bf16.mxu1 %v1922_v0 }
 0x638   :  { %v328_v1 = vpop.f32.mrf.mxu1 }
 0x639   :  { %v334_v2 = vadd.f32 %v328_v1, %v286_v63 }
 0x63a   :  { %v1661_v3 = vpop.f32.mrf.mxu1 }
 0x63b   :  { %1810 = vtanh.f32 %v334_v2  ;;  %v1543_v8 = vmul.f32 -1.442695, %v334_v2 }
 0x63c   :  { %v331_v4 = vpop.f32.mrf.mxu1 }
 0x63d   :  { %1812 = vpow2.f32 %v1543_v8 }
 0x63e   :  { %v1662_v6 = vpop.f32.mrf.mxu1 }
 0x63f   :  { %v520_v6 = vld [vmem:[#allocation2 + $0xa] sm:$0x3] }
 0x648   :  { %v1811_v7 = vpop.eup %1810 }
 0x649   :  { %344 = vrot.lane.b32.xlu0 %v1811_v7, %s1925_s30 }
 0x64a   :  { %v1813_v9 = vpop.eup %1812 }
 0x64b   :  { %v338_v10 = vadd.f32 1.0, %v1813_v9 }
 0x64d   :  { %1814 = vrcp.f32 %v338_v10 }
 0x65a   :  { %v1815_v11 = vpop.eup %1814 }
 0x65b   :  { %v342_v16 = vmul.f32 %v1815_v11, %v274_v57 }
 0x6bb   :  { %v345_v14 = vpop.permute.xlu0 %344 }
 0x6bc   :  { %v347_v15 = vmul.f32 %v1815_v11, %v345_v14 }
 0x6be   :  { %349 = vrot.lane.b32.xlu1 %v347_v15, %s1926_s3 }
 0x730   :  { %v350_v17 = vpop.permute.xlu1 %349 }
 0x731   :  { %v352_v18 = vadd.f32 %v350_v17, %v342_v16 }
 0x733   :  { %1816 = vtanh.f32 %v352_v18 }
 0x740   :  { %v1817_v19 = vpop.eup %1816 }
 0x741   :  { %355 = vrot.lane.b32.xlu0 %v1817_v19, %s1925_s30 }
 0x7b3   :  { %v356_v20 = vpop.permute.xlu0 %355 }
 0x7b4   :  { %v2073_v21 = vmul.f32 %v1815_v11, %v356_v20 }
 0x7b6   :  { %v365_v22 = vpack.c.bf16 %v2073_v21, %v2073_v21 }
 0x7b8   :  { %367 = vrot.lane.b32.xlu1 %v365_v22, %s1926_s3 }
 0x82a   :  { %v368_v23 = vpop.permute.xlu1 %367 }
 0x82b   :  { %1668 = vmatmul.mubr.msk.bf16.vlgmr.msra.gmra.mxu0 %vm133_vm3, %v368_v23 }
 0x82c   :  { %1680 = vmatpush3.bf16.msra.mxu0 %v1998_v5  ;;  %1683 = vmatprep.mubr.msk.bf16.mxu0 %vm1923_vm1, %v1922_v0 }
 0x82d   :  { %1681 = vmatprep.subr.bf16.mxu0 %v1922_v0 }
 0x830   :  { %1682 = vmatpush3.bf16.msra.mxu0 %v2017_v12 }
 0x831   :  { %1695 = vmatprep.subr.bf16.mxu0 %v1922_v0 }
 0x8eb   :  { %v406_v25 = vpop.f32.mrf.mxu0 }
 0x8ec   :  { %v412_v26 = vadd.f32 %v406_v25, %v364_v24 }
 0x8ed   :  { %v1669_v27 = vpop.f32.mrf.mxu0 }
 0x8ee   :  { %1818 = vtanh.f32 %v412_v26  ;;  %v1545_v31 = vmul.f32 -1.442695, %v412_v26 }
 0x8ef   :  { %v409_v28 = vpop.f32.mrf.mxu0 }
 0x8f0   :  { %1820 = vpow2.f32 %v1545_v31  ;;  %v598_v28 = vld [vmem:[#allocation2 + $0xc] sm:$0x3] }
 0x8f1   :  { %v1670_v29 = vpop.f32.mrf.mxu0 }
 0x8fb   :  { %v1819_v30 = vpop.eup %1818 }
 0x8fc   :  { %422 = vrot.lane.b32.xlu0 %v1819_v30, %s1925_s30 }
 0x8fd   :  { %v1821_v32 = vpop.eup %1820 }
 0x8fe   :  { %v416_v33 = vadd.f32 1.0, %v1821_v32 }
 0x900   :  { %1822 = vrcp.f32 %v416_v33 }
 0x90d   :  { %v1823_v34 = vpop.eup %1822 }
 0x90e   :  { %v420_v37 = vmul.f32 %v1823_v34, %v352_v18 }
 0x96e   :  { %v423_v35 = vpop.permute.xlu0 %422 }
 0x96f   :  { %v425_v36 = vmul.f32 %v1823_v34, %v423_v35 }
 0x971   :  { %427 = vrot.lane.b32.xlu1 %v425_v36, %s1926_s3 }
 0x9e3   :  { %v428_v38 = vpop.permute.xlu1 %427 }
 0x9e4   :  { %v430_v40 = vadd.f32 %v428_v38, %v420_v37 }
 0x9e6   :  { %1824 = vtanh.f32 %v430_v40 }
 0x9f3   :  { %v1825_v41 = vpop.eup %1824 }
 0x9f4   :  { %433 = vrot.lane.b32.xlu0 %v1825_v41, %s1925_s30 }
 0xa66   :  { %v434_v42 = vpop.permute.xlu0 %433 }
 0xa67   :  { %v2088_v43 = vmul.f32 %v1823_v34, %v434_v42 }
 0xa69   :  { %v443_v44 = vpack.c.bf16 %v2088_v43, %v2088_v43 }
 0xa6b   :  { %445 = vrot.lane.b32.xlu1 %v443_v44, %s1926_s3 }
 0xadd   :  { %v446_v45 = vpop.permute.xlu1 %445 }
 0xade   :  { %1676 = vmatmul.mubr.msk.bf16.vlgmr.msra.gmra.mxu1 %vm133_vm3, %v446_v45 }
 0xadf   :  { %1688 = vmatpush3.bf16.msra.mxu1 %v1998_v5  ;;  %1691 = vmatprep.mubr.msk.bf16.mxu1 %vm1923_vm1, %v1922_v0 }
 0xae0   :  { %1689 = vmatprep.subr.bf16.mxu1 %v1922_v0 }
 0xae3   :  { %1690 = vmatpush3.bf16.msra.mxu1 %v2017_v12 }
 0xae4   :  { %1703 = vmatprep.subr.bf16.mxu1 %v1922_v0 }
 0xb9e   :  { %v484_v47 = vpop.f32.mrf.mxu1 }
 0xb9f   :  { %v490_v48 = vadd.f32 %v484_v47, %v442_v46 }
 0xba0   :  { %v1677_v49 = vpop.f32.mrf.mxu1 }
 0xba1   :  { %1826 = vtanh.f32 %v490_v48  ;;  %v1547_v53 = vmul.f32 -1.442695, %v490_v48 }
 0xba2   :  { %v487_v50 = vpop.f32.mrf.mxu1 }
 0xba3   :  { %1828 = vpow2.f32 %v1547_v53 }
 0xba4   :  { %v1678_v51 = vpop.f32.mrf.mxu1 }
 0xba5   :  { %v676_v51 = vld [vmem:[#allocation2 + $0xe] sm:$0x3] }
 0xbae   :  { %v1827_v52 = vpop.eup %1826 }
 0xbaf   :  { %500 = vrot.lane.b32.xlu0 %v1827_v52, %s1925_s30 }
 0xbb0   :  { %v1829_v54 = vpop.eup %1828 }
 0xbb1   :  { %v494_v55 = vadd.f32 1.0, %v1829_v54 }
 0xbb3   :  { %1830 = vrcp.f32 %v494_v55 }
 0xbc0   :  { %v1831_v56 = vpop.eup %1830 }
 0xbc1   :  { %v498_v59 = vmul.f32 %v1831_v56, %v430_v40 }
 0xc21   :  { %v501_v57 = vpop.permute.xlu0 %500 }
 0xc22   :  { %v503_v58 = vmul.f32 %v1831_v56, %v501_v57 }
 0xc24   :  { %505 = vrot.lane.b32.xlu1 %v503_v58, %s1926_s3 }
 0xc96   :  { %v506_v61 = vpop.permute.xlu1 %505 }
 0xc97   :  { %v508_v62 = vadd.f32 %v506_v61, %v498_v59 }
 0xc99   :  { %1832 = vtanh.f32 %v508_v62 }
 0xca6   :  { %v1833_v63 = vpop.eup %1832 }
 0xca7   :  { %511 = vrot.lane.b32.xlu0 %v1833_v63, %s1925_s30 }
 0xd19   :  { %v512_v1 = vpop.permute.xlu0 %511 }
 0xd1a   :  { %v2103_v2 = vmul.f32 %v1831_v56, %v512_v1 }
 0xd1c   :  { %v521_v3 = vpack.c.bf16 %v2103_v2, %v2103_v2 }
 0xd1e   :  { %523 = vrot.lane.b32.xlu1 %v521_v3, %s1926_s3 }
 0xd90   :  { %v524_v4 = vpop.permute.xlu1 %523 }
 0xd91   :  { %1684 = vmatmul.mubr.msk.bf16.vlgmr.msra.gmra.mxu0 %vm133_vm3, %v524_v4 }
 0xd92   :  { %1696 = vmatpush3.bf16.msra.mxu0 %v1998_v5  ;;  %1699 = vmatprep.mubr.msk.bf16.mxu0 %vm1923_vm1, %v1922_v0 }
 0xd93   :  { %1697 = vmatprep.subr.bf16.mxu0 %v1922_v0 }
 0xd96   :  { %1698 = vmatpush3.bf16.msra.mxu0 %v2017_v12 }
 0xd97   :  { %1711 = vmatprep.subr.bf16.mxu0 %v1922_v0 }
 0xe51   :  { %v562_v7 = vpop.f32.mrf.mxu0 }
 0xe52   :  { %v568_v8 = vadd.f32 %v562_v7, %v520_v6 }
 0xe53   :  { %v1685_v9 = vpop.f32.mrf.mxu0 }
 0xe54   :  { %1834 = vtanh.f32 %v568_v8  ;;  %v1549_v5 = vmul.f32 -1.442695, %v568_v8 }
 0xe55   :  { %v565_v10 = vpop.f32.mrf.mxu0 }
 0xe56   :  { %1836 = vpow2.f32 %v1549_v5  ;;  %v59_v10 = vld [vmem:[%s2365_s4 + $0x18] sm:$0xff] }
 0xe57   :  { %v1686_v11 = vpop.f32.mrf.mxu0 }
 0xe58   :  { %v56_v11 = vld [vmem:[%s2365_s4] sm:$0xff] }
 0xe61   :  { %v1835_v14 = vpop.eup %1834 }
 0xe62   :  { %578 = vrot.lane.b32.xlu0 %v1835_v14, %s1925_s30 }
 0xe63   :  { %v1837_v15 = vpop.eup %1836 }
 0xe64   :  { %v572_v16 = vadd.f32 1.0, %v1837_v15 }
 0xe66   :  { %1838 = vrcp.f32 %v572_v16 }
 0xe73   :  { %v1839_v17 = vpop.eup %1838 }
 0xe74   :  { %v576_v19 = vmul.f32 %v1839_v17, %v508_v62 }
 0xed4   :  { %v579_v18 = vpop.permute.xlu0 %578 }
 0xed5   :  { %v581_v12 = vmul.f32 %v1839_v17, %v579_v18 }
 0xed7   :  { %583 = vrot.lane.b32.xlu1 %v581_v12, %s1926_s3 }
 0xf49   :  { %v584_v20 = vpop.permute.xlu1 %583 }
 0xf4a   :  { %v586_v22 = vadd.f32 %v584_v20, %v576_v19 }
 0xf4c   :  { %1840 = vtanh.f32 %v586_v22 }
 0xf59   :  { %v1841_v23 = vpop.eup %1840 }
 0xf5a   :  { %589 = vrot.lane.b32.xlu0 %v1841_v23, %s1925_s30  ;;  %v47_v23 = vld [vmem:[%s2366_s6] sm:$0xff] }
 0xfcc   :  { %v590_v24 = vpop.permute.xlu0 %589 }
 0xfcd   :  { %v2118_v25 = vmul.f32 %v1839_v17, %v590_v24  ;;  %v48_v24 = vld [vmem:[%s2366_s6 + $0x8] sm:$0xff] }
 0xfcf   :  { %v599_v26 = vpack.c.bf16 %v2118_v25, %v2118_v25 }
 0xfd1   :  { %601 = vrot.lane.b32.xlu1 %v599_v26, %s1926_s3  ;;  %v52_v26 = vld [vmem:[%s2367_s7 + $0x10] sm:$0xff] }
0x1043   :  { %v602_v27 = vpop.permute.xlu1 %601 }
0x1044   :  { %1692 = vmatmul.mubr.msk.bf16.vlgmr.msra.gmra.mxu1 %vm133_vm3, %v602_v27  ;;  %v53_v27 = vld [vmem:[%s2367_s7 + $0x18] sm:$0xff] }
0x1045   :  { %1707 = vmatprep.mubr.msk.bf16.mxu1 %vm1923_vm1, %v1922_v0 }
0x1104   :  { %v640_v29 = vpop.f32.mrf.mxu1 }
0x1105   :  { %v646_v30 = vadd.f32 %v640_v29, %v598_v28  ;;  %v2187_v28 = vpack.c.bf16 %v53_v27, %v52_v26  ;;  %v50_v29 = vld [vmem:[%s2367_s7] sm:$0xff] }
0x1106   :  { %v1693_v31 = vpop.f32.mrf.mxu1 }
0x1107   :  { %1842 = vtanh.f32 %v646_v30  ;;  %v1551_v35 = vmul.f32 -1.442695, %v646_v30  ;;  %v51_v30 = vld [vmem:[%s2367_s7 + $0x8] sm:$0xff] }
0x1108   :  { %v643_v32 = vpop.f32.mrf.mxu1  ;;  %v2198_v31 = vpack.c.bf16 %v51_v30, %v50_v29 }
0x1109   :  { %1844 = vpow2.f32 %v1551_v35 }
0x110a   :  { %v1694_v33 = vpop.f32.mrf.mxu1 }
0x110b   :  { %v1554_v33 = vld [vmem:[%s2368_s5] ss:$0 sm:$0xff] }
0x1114   :  { %v1843_v34 = vpop.eup %1842 }
0x1115   :  { %656 = vrot.lane.b32.xlu0 %v1843_v34, %s1925_s30 }
0x1116   :  { %v1845_v36 = vpop.eup %1844 }
0x1117   :  { %v650_v37 = vadd.f32 1.0, %v1845_v36 }
0x1119   :  { %1846 = vrcp.f32 %v650_v37 }
0x1126   :  { %v1847_v38 = vpop.eup %1846 }
0x1127   :  { %v654_v42 = vmul.f32 %v1847_v38, %v586_v22 }
0x1187   :  { %v657_v40 = vpop.permute.xlu0 %656 }
0x1188   :  { %v659_v41 = vmul.f32 %v1847_v38, %v657_v40 }
0x118a   :  { %661 = vrot.lane.b32.xlu1 %v659_v41, %s1926_s3 }
0x11fc   :  { %v662_v44 = vpop.permute.xlu1 %661 }
0x11fd   :  { %v664_v45 = vadd.f32 %v662_v44, %v654_v42 }
0x11ff   :  { %1848 = vtanh.f32 %v664_v45 }
0x120c   :  { %v1849_v46 = vpop.eup %1848 }
0x120d   :  { %667 = vrot.lane.b32.xlu0 %v1849_v46, %s1925_s30 }
0x127f   :  { %v668_v47 = vpop.permute.xlu0 %667 }
0x1280   :  { %v670_v48 = vmul.f32 %v1847_v38, %v668_v47 }
0x1282   :  { %v677_v49 = vpack.c.bf16 %v670_v48, %v670_v48 }
0x1284   :  { %679 = vrot.lane.b32.xlu1 %v677_v49, %s1926_s3 }
0x12f6   :  { %v680_v50 = vpop.permute.xlu1 %679 }
0x12f7   :  { %1700 = vmatmul.mubr.msk.bf16.vlgmr.msra.gmra.mxu0 %vm133_vm3, %v680_v50 }
0x12f8   :  { %1713 = vmatprep.mubr.msk.bf16.mxu0 %vm1923_vm1, %v1922_v0 }
0x13b7   :  { %v718_v52 = vpop.f32.mrf.mxu0 }
0x13b8   :  { %v724_v53 = vadd.f32 %v718_v52, %v676_v51 }
0x13b9   :  { %v1701_v54 = vpop.f32.mrf.mxu0 }
0x13ba   :  { %1850 = vtanh.f32 %v724_v53  ;;  %v1553_v58 = vmul.f32 -1.442695, %v724_v53 }
0x13bb   :  { %v721_v55 = vpop.f32.mrf.mxu0 }
0x13bc   :  { %1852 = vpow2.f32 %v1553_v58 }
0x13bd   :  { %v1702_v56 = vpop.f32.mrf.mxu0 }
0x13c7   :  { %v1851_v57 = vpop.eup %1850 }
0x13c8   :  { %734 = vrot.lane.b32.xlu0 %v1851_v57, %s1925_s30 }
0x13c9   :  { %v1853_v59 = vpop.eup %1852 }
0x13ca   :  { %v728_v61 = vadd.f32 1.0, %v1853_v59 }
0x13cc   :  { %1854 = vrcp.f32 %v728_v61 }
0x13d9   :  { %v1855_v62 = vpop.eup %1854 }
0x13da   :  { %v732_v3 = vmul.f32 %v1855_v62, %v664_v45  ;;  %v1556_v45 = vld [vmem:[%s2369_s8] ss:$0 sm:$0xff] }
0x143a   :  { %v735_v63 = vpop.permute.xlu0 %734 }
0x143b   :  { %v737_v1 = vmul.f32 %v1855_v62, %v735_v63 }
0x143d   :  { %739 = vrot.lane.b32.xlu1 %v737_v1, %s1926_s3 }
0x1441   :  { %203 = vrot.lane.b32.xlu1 %v2043_v39, %s1926_s3 }
0x1445   :  { %360 = vrot.lane.b32.xlu1 %v2073_v21, %s1926_s3 }
0x1449   :  { %516 = vrot.lane.b32.xlu1 %v2103_v2, %s1926_s3  ;;  %v58_v2 = vld [vmem:[%s2365_s4 + $0x10] sm:$0xff] }
0x144a   :  { %v61_v14 = vpack.c.bf16 %v59_v10, %v58_v2 }
0x144c   :  { %1704 = vmatpush3.bf16.msra.mxu1 %v61_v14 }
0x144d   :  { %672 = vrot.lane.b32.xlu1 %v670_v48, %s1926_s3  ;;  %1705 = vmatprep.subr.bf16.mxu1 %v1922_v0 }
0x14af   :  { %v740_v4 = vpop.permute.xlu1 %739 }
0x14b0   :  { %v742_v6 = vadd.f32 %v740_v4, %v732_v3 }
0x14b2   :  { %1856 = vtanh.f32 %v742_v6 }
0x14b3   :  { %v204_v7 = vpop.permute.xlu1 %203 }
0x14b4   :  { %207 = vst.msk [vmem:[#allocation3] sm:$0x3] %vm206_vm4, %v204_v7 }
0x14b7   :  { %v361_v8 = vpop.permute.xlu1 %360 }
0x14b8   :  { %363 = vst.msk [vmem:[#allocation3 + $0x4] sm:$0x3] %vm206_vm4, %v361_v8 }
0x14bb   :  { %v517_v39 = vpop.permute.xlu1 %516 }
0x14bc   :  { %519 = vst.msk [vmem:[#allocation3 + $0x8] sm:$0x3] %vm206_vm4, %v517_v39 }
0x14bf   :  { %v1857_v21 = vpop.eup %1856  ;;  %v673_v9 = vpop.permute.xlu1 %672 }
0x14c0   :  { %675 = vst.msk [vmem:[#allocation3 + $0xc] sm:$0x3] %vm206_vm4, %v673_v9  ;;  %745 = vrot.lane.b32.xlu0 %v1857_v21, %s1925_s30 }
0x14c4   :  { %282 = vrot.lane.b32.xlu0 %v2058_v60, %s1926_s3  ;;  %v57_v60 = vld [vmem:[%s2365_s4 + $0x8] sm:$0xff] }
0x14c8   :  { %438 = vrot.lane.b32.xlu0 %v2088_v43, %s1926_s3  ;;  %v60_v43 = vpack.c.bf16 %v57_v60, %v56_v11 }
0x14ca   :  { %1706 = vmatpush3.bf16.msra.mxu1 %v60_v43 }
0x14cb   :  { %1717 = vmatprep.subr.bf16.mxu1 %v1922_v0 }
0x14cc   :  { %594 = vrot.lane.b32.xlu0 %v2118_v25, %s1926_s3  ;;  %v49_v25 = vpack.c.bf16 %v48_v24, %v47_v23 }
0x14ce   :  { %1712 = vmatpush3.bf16.msra.mxu0 %v49_v25 }
0x14cf   :  { %1725 = vmatprep.subr.bf16.mxu0 %v1922_v0 }
0x1532   :  { %v746_v5 = vpop.permute.xlu0 %745 }
0x1533   :  { %v748_v15 = vmul.f32 %v1855_v62, %v746_v5 }
0x1535   :  { %750 = vrot.lane.b32.xlu0 %v748_v15, %s1926_s3 }
0x1536   :  { %v283_v16 = vpop.permute.xlu0 %282 }
0x1537   :  { %285 = vst.msk [vmem:[#allocation3 + $0x2] sm:$0x3] %vm206_vm4, %v283_v16 }
0x153a   :  { %v439_v17 = vpop.permute.xlu0 %438 }
0x153b   :  { %441 = vst.msk [vmem:[#allocation3 + $0x6] sm:$0x3] %vm206_vm4, %v439_v17 }
0x153e   :  { %v595_v18 = vpop.permute.xlu0 %594 }
0x153f   :  { %597 = vst.msk [vmem:[#allocation3 + $0xa] sm:$0x3] %vm206_vm4, %v595_v18 }
0x1542   :  { %v754_v19 = vld [vmem:[#allocation3] sm:$0xff] }
0x15a7   :  { %v751_v12 = vpop.permute.xlu0 %750 }
0x15a8   :  { %753 = vst.msk [vmem:[#allocation3 + $0xe] sm:$0x3] %vm206_vm4, %v751_v12 }
0x15af   :  { %v755_v20 = vld [vmem:[#allocation3 + $0x8] sm:$0xff] }
0x15b0   :  { %v756_v22 = vpack.c.bf16 %v755_v20, %v754_v19 }
0x15b2   :  { %1708 = vmatmul.mubr.msk.bf16.vlgmr.msra.gmra.mxu1 %vm133_vm3, %v756_v22 }
0x15b3   :  { %1721 = vmatprep.mubr.msk.bf16.mxu1 %vm1923_vm1, %v1922_v0  ;;  %1718 = vmatpush3.bf16.msra.mxu1 %v2187_v28 }
0x15b4   :  { %1719 = vmatprep.subr.bf16.mxu1 %v1922_v0 }
0x15b7   :  { %1720 = vmatpush3.bf16.msra.mxu1 %v2198_v31 }
0x15b8   :  { %1733 = vmatprep.subr.bf16.mxu1 %v1922_v0 }
0x15ba   :  { %1722 = vmatmul.mubr.bf16.vlgmr.msra.gmra.mxu1 %v1924_v13 }
0x15bb   :  { %1734 = vmatpush3.bf16.msra.mxu1 %v2187_v28  ;;  %1737 = vmatprep.mubr.msk.bf16.mxu1 %vm1923_vm1, %v1922_v0 }
0x15bc   :  { %1735 = vmatprep.subr.bf16.mxu1 %v1922_v0 }
0x15bf   :  { %1736 = vmatpush3.bf16.msra.mxu1 %v2198_v31 }
0x15c0   :  { %1749 = vmatprep.subr.bf16.mxu1 %v1922_v0 }
0x1672   :  { %v800_v32 = vpop.f32.mrf.mxu1 }
0x1673   :  { %v801_v36 = vadd.f32 %v1554_v33, %v800_v32 }
0x1674   :  { %v1709_v34 = vpop.f32.mrf.mxu1 }
0x1676   :  { %v803_v35 = vpop.f32.mrf.mxu1 }
0x1677   :  { %v804_v13 = vadd.f32 %v1554_v33, %v803_v35 }
0x1678   :  { %v1710_v37 = vpop.f32.mrf.mxu1 }
0x1679   :  { %v807_v38 = vpack.c.bf16 %v804_v13, %v801_v36 }
0x167a   :  { %v896_v40 = vpop.f32.mrf.mxu1 }
0x167b   :  { %1714 = vmatmul.mubr.msk.bf16.vlgmr.msra.gmra.mxu0 %vm814_vm5, %v807_v38 }
0x167c   :  { %1726 = vmatpush3.bf16.msra.mxu0 %v2187_v28  ;;  %1729 = vmatprep.mubr.msk.bf16.mxu0 %vm1923_vm1, %v1922_v0  ;;  %v1723_v41 = vpop.f32.mrf.mxu1 }
0x167d   :  { %1727 = vmatprep.subr.bf16.mxu0 %v1922_v0 }
0x167e   :  { %v899_v42 = vpop.f32.mrf.mxu1 }
0x1680   :  { %1728 = vmatpush3.bf16.msra.mxu0 %v2198_v31  ;;  %v1724_v44 = vpop.f32.mrf.mxu1 }
0x1681   :  { %1741 = vmatprep.subr.bf16.mxu0 %v1922_v0 }
0x173b   :  { %v852_v46 = vpop.f32.mrf.mxu0 }
0x173c   :  { %v853_v47 = vadd.f32 %v1556_v45, %v852_v46 }
0x173d   :  { %v1715_v48 = vpop.f32.mrf.mxu0 }
0x173e   :  { %859 = vst [vmem:[#allocation2] sm:$0xff] %v853_v47 }
0x173f   :  { %v855_v49 = vpop.f32.mrf.mxu0 }
0x1740   :  { %v856_v50 = vadd.f32 %v1556_v45, %v855_v49 }
0x1741   :  { %v1716_v51 = vpop.f32.mrf.mxu0 }
0x1742   :  { %860 = vst [vmem:[#allocation2 + $0x8] sm:$0xff] %v856_v50 }
0x1745   :  { %v861_v52 = vld [vmem:[#allocation2] sm:$0x3]  ;;  %v932_v39 = vld [vmem:[#allocation2 + $0x2] sm:$0x3]  ;;  %v1010_v26 = vld [vmem:[#allocation2 + $0x4] sm:$0x3] }
0x1746   :  { %v902_v53 = vadd.f32 %v896_v40, %v861_v52  ;;  %v1088_v50 = vld [vmem:[#allocation2 + $0x6] sm:$0x3] }
0x1748   :  { %1858 = vtanh.f32 %v902_v53  ;;  %v1558_v55 = vmul.f32 -1.442695, %v902_v53 }
0x174a   :  { %1860 = vpow2.f32 %v1558_v55 }
0x1755   :  { %v1859_v54 = vpop.eup %1858 }
0x1756   :  { %912 = vrot.lane.b32.xlu1 %v1859_v54, %s1925_s30 }
0x1757   :  { %v1861_v56 = vpop.eup %1860 }
0x1758   :  { %v906_v57 = vadd.f32 1.0, %v1861_v56 }
0x175a   :  { %1862 = vrcp.f32 %v906_v57 }
0x1767   :  { %v1863_v58 = vpop.eup %1862 }
0x1768   :  { %v910_v62 = vmul.f32 0.0, %v1863_v58 }
0x17c8   :  { %v913_v59 = vpop.permute.xlu1 %912 }
0x17c9   :  { %v915_v61 = vmul.f32 %v1863_v58, %v913_v59 }
0x17cb   :  { %917 = vrot.lane.b32.xlu0 %v915_v61, %s1926_s3 }
0x183d   :  { %v918_v63 = vpop.permute.xlu0 %917 }
0x183e   :  { %v920_v1 = vadd.f32 %v918_v63, %v910_v62 }
0x1840   :  { %1864 = vtanh.f32 %v920_v1 }
0x184d   :  { %v1865_v3 = vpop.eup %1864 }
0x184e   :  { %923 = vrot.lane.b32.xlu1 %v1865_v3, %s1925_s30 }
0x18c0   :  { %v924_v4 = vpop.permute.xlu1 %923 }
0x18c1   :  { %v2224_v6 = vmul.f32 %v1863_v58, %v924_v4 }
0x18c3   :  { %v933_v7 = vpack.c.bf16 %v2224_v6, %v2224_v6 }
0x18c5   :  { %935 = vrot.lane.b32.xlu0 %v933_v7, %s1926_s3 }
0x1937   :  { %v936_v8 = vpop.permute.xlu0 %935 }
0x1938   :  { %1730 = vmatmul.mubr.msk.bf16.vlgmr.msra.gmra.mxu0 %vm133_vm3, %v936_v8 }
0x1939   :  { %1742 = vmatpush3.bf16.msra.mxu0 %v2187_v28  ;;  %1745 = vmatprep.mubr.msk.bf16.mxu0 %vm1923_vm1, %v1922_v0 }
0x193a   :  { %1743 = vmatprep.subr.bf16.mxu0 %v1922_v0 }
0x193d   :  { %1744 = vmatpush3.bf16.msra.mxu0 %v2198_v31 }
0x193e   :  { %1757 = vmatprep.subr.bf16.mxu0 %v1922_v0 }
0x19f8   :  { %v974_v21 = vpop.f32.mrf.mxu0 }
0x19f9   :  { %v980_v9 = vadd.f32 %v974_v21, %v932_v39 }
0x19fa   :  { %v1731_v2 = vpop.f32.mrf.mxu0 }
0x19fb   :  { %1866 = vtanh.f32 %v980_v9  ;;  %v1560_v60 = vmul.f32 -1.442695, %v980_v9  ;;  %v1166_v2 = vld [vmem:[#allocation2 + $0x8] sm:$0x3] }
0x19fc   :  { %v977_v10 = vpop.f32.mrf.mxu0 }
0x19fd   :  { %1868 = vpow2.f32 %v1560_v60 }
0x19fe   :  { %v1732_v11 = vpop.f32.mrf.mxu0 }
0x1a08   :  { %v1867_v14 = vpop.eup %1866 }
0x1a09   :  { %990 = vrot.lane.b32.xlu1 %v1867_v14, %s1925_s30 }
0x1a0a   :  { %v1869_v43 = vpop.eup %1868 }
0x1a0b   :  { %v984_v5 = vadd.f32 1.0, %v1869_v43 }
0x1a0d   :  { %1870 = vrcp.f32 %v984_v5 }
0x1a1a   :  { %v1871_v15 = vpop.eup %1870 }
0x1a1b   :  { %v988_v18 = vmul.f32 %v1871_v15, %v920_v1 }
0x1a7b   :  { %v991_v16 = vpop.permute.xlu1 %990 }
0x1a7c   :  { %v993_v17 = vmul.f32 %v1871_v15, %v991_v16 }
0x1a7e   :  { %995 = vrot.lane.b32.xlu0 %v993_v17, %s1926_s3 }
0x1af0   :  { %v996_v12 = vpop.permute.xlu0 %995 }
0x1af1   :  { %v998_v19 = vadd.f32 %v996_v12, %v988_v18 }
0x1af3   :  { %1872 = vtanh.f32 %v998_v19 }
0x1b00   :  { %v1873_v20 = vpop.eup %1872 }
0x1b01   :  { %1001 = vrot.lane.b32.xlu1 %v1873_v20, %s1925_s30 }
0x1b73   :  { %v1002_v22 = vpop.permute.xlu1 %1001 }
0x1b74   :  { %v2239_v23 = vmul.f32 %v1871_v15, %v1002_v22 }
0x1b76   :  { %v1011_v24 = vpack.c.bf16 %v2239_v23, %v2239_v23 }
0x1b78   :  { %1013 = vrot.lane.b32.xlu0 %v1011_v24, %s1926_s3 }
0x1bea   :  { %v1014_v25 = vpop.permute.xlu0 %1013 }
0x1beb   :  { %1738 = vmatmul.mubr.msk.bf16.vlgmr.msra.gmra.mxu1 %vm133_vm3, %v1014_v25 }
0x1bec   :  { %1750 = vmatpush3.bf16.msra.mxu1 %v2187_v28  ;;  %1753 = vmatprep.mubr.msk.bf16.mxu1 %vm1923_vm1, %v1922_v0 }
0x1bed   :  { %1751 = vmatprep.subr.bf16.mxu1 %v1922_v0 }
0x1bf0   :  { %1752 = vmatpush3.bf16.msra.mxu1 %v2198_v31 }
0x1bf1   :  { %1765 = vmatprep.subr.bf16.mxu1 %v1922_v0 }
0x1cab   :  { %v1052_v27 = vpop.f32.mrf.mxu1 }
0x1cac   :  { %v1058_v29 = vadd.f32 %v1052_v27, %v1010_v26 }
0x1cad   :  { %v1739_v30 = vpop.f32.mrf.mxu1 }
0x1cae   :  { %1874 = vtanh.f32 %v1058_v29  ;;  %v1562_v35 = vmul.f32 -1.442695, %v1058_v29 }
0x1caf   :  { %v1055_v32 = vpop.f32.mrf.mxu1 }
0x1cb0   :  { %1876 = vpow2.f32 %v1562_v35  ;;  %v1244_v32 = vld [vmem:[#allocation2 + $0xa] sm:$0x3] }
0x1cb1   :  { %v1740_v33 = vpop.f32.mrf.mxu1 }
0x1cbb   :  { %v1875_v34 = vpop.eup %1874 }
0x1cbc   :  { %1068 = vrot.lane.b32.xlu1 %v1875_v34, %s1925_s30 }
0x1cbd   :  { %v1877_v36 = vpop.eup %1876 }
0x1cbe   :  { %v1062_v13 = vadd.f32 1.0, %v1877_v36 }
0x1cc0   :  { %1878 = vrcp.f32 %v1062_v13 }
0x1ccd   :  { %v1879_v37 = vpop.eup %1878 }
0x1cce   :  { %v1066_v41 = vmul.f32 %v1879_v37, %v998_v19 }
0x1d2e   :  { %v1069_v38 = vpop.permute.xlu1 %1068 }
0x1d2f   :  { %v1071_v40 = vmul.f32 %v1879_v37, %v1069_v38 }
0x1d31   :  { %1073 = vrot.lane.b32.xlu0 %v1071_v40, %s1926_s3 }
0x1da3   :  { %v1074_v42 = vpop.permute.xlu0 %1073 }
0x1da4   :  { %v1076_v44 = vadd.f32 %v1074_v42, %v1066_v41 }
0x1da6   :  { %1880 = vtanh.f32 %v1076_v44 }
0x1db3   :  { %v1881_v45 = vpop.eup %1880 }
0x1db4   :  { %1079 = vrot.lane.b32.xlu1 %v1881_v45, %s1925_s30 }
0x1e26   :  { %v1080_v46 = vpop.permute.xlu1 %1079 }
0x1e27   :  { %v2254_v47 = vmul.f32 %v1879_v37, %v1080_v46 }
0x1e29   :  { %v1089_v48 = vpack.c.bf16 %v2254_v47, %v2254_v47 }
0x1e2b   :  { %1091 = vrot.lane.b32.xlu0 %v1089_v48, %s1926_s3 }
0x1e9d   :  { %v1092_v49 = vpop.permute.xlu0 %1091 }
0x1e9e   :  { %1746 = vmatmul.mubr.msk.bf16.vlgmr.msra.gmra.mxu0 %vm133_vm3, %v1092_v49 }
0x1e9f   :  { %1758 = vmatpush3.bf16.msra.mxu0 %v2187_v28  ;;  %1761 = vmatprep.mubr.msk.bf16.mxu0 %vm1923_vm1, %v1922_v0 }
0x1ea0   :  { %1759 = vmatprep.subr.bf16.mxu0 %v1922_v0 }
0x1ea3   :  { %1760 = vmatpush3.bf16.msra.mxu0 %v2198_v31 }
0x1ea4   :  { %1773 = vmatprep.subr.bf16.mxu0 %v1922_v0 }
0x1f5e   :  { %v1130_v51 = vpop.f32.mrf.mxu0 }
0x1f5f   :  { %v1136_v52 = vadd.f32 %v1130_v51, %v1088_v50 }
0x1f60   :  { %v1747_v53 = vpop.f32.mrf.mxu0 }
0x1f61   :  { %1882 = vtanh.f32 %v1136_v52  ;;  %v1564_v57 = vmul.f32 -1.442695, %v1136_v52  ;;  %v1322_v53 = vld [vmem:[#allocation2 + $0xc] sm:$0x3] }
0x1f62   :  { %v1133_v54 = vpop.f32.mrf.mxu0 }
0x1f63   :  { %1884 = vpow2.f32 %v1564_v57 }
0x1f64   :  { %v1748_v55 = vpop.f32.mrf.mxu0 }
0x1f6e   :  { %v1883_v56 = vpop.eup %1882 }
0x1f6f   :  { %1146 = vrot.lane.b32.xlu1 %v1883_v56, %s1925_s30 }
0x1f70   :  { %v1885_v58 = vpop.eup %1884 }
0x1f71   :  { %v1140_v59 = vadd.f32 1.0, %v1885_v58 }
0x1f73   :  { %1886 = vrcp.f32 %v1140_v59 }
0x1f80   :  { %v1887_v61 = vpop.eup %1886 }
0x1f81   :  { %v1144_v1 = vmul.f32 %v1887_v61, %v1076_v44 }
0x1fe1   :  { %v1147_v62 = vpop.permute.xlu1 %1146 }
0x1fe2   :  { %v1149_v63 = vmul.f32 %v1887_v61, %v1147_v62 }
0x1fe4   :  { %1151 = vrot.lane.b32.xlu0 %v1149_v63, %s1926_s3 }
0x2056   :  { %v1152_v3 = vpop.permute.xlu0 %1151 }
0x2057   :  { %v1154_v4 = vadd.f32 %v1152_v3, %v1144_v1 }
0x2059   :  { %1888 = vtanh.f32 %v1154_v4 }
0x2066   :  { %v1889_v7 = vpop.eup %1888 }
0x2067   :  { %1157 = vrot.lane.b32.xlu1 %v1889_v7, %s1925_s30 }
0x20d9   :  { %v1158_v8 = vpop.permute.xlu1 %1157 }
0x20da   :  { %v2269_v39 = vmul.f32 %v1887_v61, %v1158_v8 }
0x20dc   :  { %v1167_v21 = vpack.c.bf16 %v2269_v39, %v2269_v39 }
0x20de   :  { %1169 = vrot.lane.b32.xlu0 %v1167_v21, %s1926_s3 }
0x2150   :  { %v1170_v9 = vpop.permute.xlu0 %1169 }
0x2151   :  { %1754 = vmatmul.mubr.msk.bf16.vlgmr.msra.gmra.mxu1 %vm133_vm3, %v1170_v9 }
0x2152   :  { %1766 = vmatpush3.bf16.msra.mxu1 %v2187_v28  ;;  %1769 = vmatprep.mubr.msk.bf16.mxu1 %vm1923_vm1, %v1922_v0 }
0x2153   :  { %1767 = vmatprep.subr.bf16.mxu1 %v1922_v0 }
0x2156   :  { %1768 = vmatpush3.bf16.msra.mxu1 %v2198_v31 }
0x2157   :  { %1781 = vmatprep.subr.bf16.mxu1 %v1922_v0 }
0x2211   :  { %v1208_v10 = vpop.f32.mrf.mxu1 }
0x2212   :  { %v1214_v11 = vadd.f32 %v1208_v10, %v1166_v2 }
0x2213   :  { %v1755_v14 = vpop.f32.mrf.mxu1 }
0x2214   :  { %1890 = vtanh.f32 %v1214_v11  ;;  %v1566_v15 = vmul.f32 -1.442695, %v1214_v11 }
0x2215   :  { %v1211_v60 = vpop.f32.mrf.mxu1 }
0x2216   :  { %1892 = vpow2.f32 %v1566_v15  ;;  %v1400_v60 = vld [vmem:[#allocation2 + $0xe] sm:$0x3] }
0x2217   :  { %v1756_v43 = vpop.f32.mrf.mxu1 }
0x2221   :  { %v1891_v5 = vpop.eup %1890 }
0x2222   :  { %1224 = vrot.lane.b32.xlu1 %v1891_v5, %s1925_s30 }
0x2223   :  { %v1893_v16 = vpop.eup %1892 }
0x2224   :  { %v1218_v17 = vadd.f32 1.0, %v1893_v16 }
0x2226   :  { %1894 = vrcp.f32 %v1218_v17 }
0x2233   :  { %v1895_v18 = vpop.eup %1894 }
0x2234   :  { %v1222_v20 = vmul.f32 %v1895_v18, %v1154_v4 }
0x2294   :  { %v1225_v12 = vpop.permute.xlu1 %1224 }
0x2295   :  { %v1227_v19 = vmul.f32 %v1895_v18, %v1225_v12 }
0x2297   :  { %1229 = vrot.lane.b32.xlu0 %v1227_v19, %s1926_s3 }
0x2309   :  { %v1230_v22 = vpop.permute.xlu0 %1229 }
0x230a   :  { %v1232_v24 = vadd.f32 %v1230_v22, %v1222_v20 }
0x230c   :  { %1896 = vtanh.f32 %v1232_v24 }
0x2319   :  { %v1897_v25 = vpop.eup %1896 }
0x231a   :  { %1235 = vrot.lane.b32.xlu1 %v1897_v25, %s1925_s30 }
0x238c   :  { %v1236_v26 = vpop.permute.xlu1 %1235 }
0x238d   :  { %v2284_v27 = vmul.f32 %v1895_v18, %v1236_v26 }
0x238f   :  { %v1245_v29 = vpack.c.bf16 %v2284_v27, %v2284_v27 }
0x2391   :  { %1247 = vrot.lane.b32.xlu0 %v1245_v29, %s1926_s3 }
0x2403   :  { %v1248_v30 = vpop.permute.xlu0 %1247 }
0x2404   :  { %1762 = vmatmul.mubr.msk.bf16.vlgmr.msra.gmra.mxu0 %vm133_vm3, %v1248_v30 }
0x2405   :  { %1774 = vmatpush3.bf16.msra.mxu0 %v2187_v28  ;;  %1777 = vmatprep.mubr.msk.bf16.mxu0 %vm1923_vm1, %v1922_v0 }
0x2406   :  { %1775 = vmatprep.subr.bf16.mxu0 %v1922_v0 }
0x2409   :  { %1776 = vmatpush3.bf16.msra.mxu0 %v2198_v31 }
0x24c4   :  { %v1286_v33 = vpop.f32.mrf.mxu0 }
0x24c5   :  { %v1292_v34 = vadd.f32 %v1286_v33, %v1244_v32 }
0x24c6   :  { %v1763_v35 = vpop.f32.mrf.mxu0 }
0x24c7   :  { %1898 = vtanh.f32 %v1292_v34  ;;  %v1568_v38 = vmul.f32 -1.442695, %v1292_v34  ;;  %v65_v35 = vld [vmem:[%s2370_s9 + $0x18] sm:$0xff] }
0x24c8   :  { %v1289_v36 = vpop.f32.mrf.mxu0 }
0x24c9   :  { %1900 = vpow2.f32 %v1568_v38  ;;  %v62_v36 = vld [vmem:[%s2370_s9] sm:$0xff] }
0x24ca   :  { %v1764_v13 = vpop.f32.mrf.mxu0 }
0x24d4   :  { %v1899_v37 = vpop.eup %1898 }
0x24d5   :  { %1302 = vrot.lane.b32.xlu1 %v1899_v37, %s1925_s30 }
0x24d6   :  { %v1901_v28 = vpop.eup %1900 }
0x24d7   :  { %v1296_v40 = vadd.f32 1.0, %v1901_v28 }
0x24d9   :  { %1902 = vrcp.f32 %v1296_v40 }
0x24e6   :  { %v1903_v41 = vpop.eup %1902 }
0x24e7   :  { %v1300_v31 = vmul.f32 %v1903_v41, %v1232_v24 }
0x2547   :  { %v1303_v42 = vpop.permute.xlu1 %1302 }
0x2548   :  { %v1305_v44 = vmul.f32 %v1903_v41, %v1303_v42 }
0x254a   :  { %1307 = vrot.lane.b32.xlu0 %v1305_v44, %s1926_s3 }
0x25bc   :  { %v1308_v45 = vpop.permute.xlu0 %1307 }
0x25bd   :  { %v1310_v46 = vadd.f32 %v1308_v45, %v1300_v31  ;;  %v1573_v45 = vld [vmem:[%s2371_s10] ss:$0 sm:$0xff] }
0x25bf   :  { %1904 = vtanh.f32 %v1310_v46 }
0x25cc   :  { %v1905_v48 = vpop.eup %1904 }
0x25cd   :  { %1313 = vrot.lane.b32.xlu1 %v1905_v48, %s1925_s30 }
0x263f   :  { %v1314_v49 = vpop.permute.xlu1 %1313 }
0x2640   :  { %v2298_v50 = vmul.f32 %v1903_v41, %v1314_v49 }
0x2642   :  { %v1323_v51 = vpack.c.bf16 %v2298_v50, %v2298_v50 }
0x2644   :  { %1325 = vrot.lane.b32.xlu0 %v1323_v51, %s1926_s3 }
0x26b6   :  { %v1326_v52 = vpop.permute.xlu0 %1325 }
0x26b7   :  { %1770 = vmatmul.mubr.msk.bf16.vlgmr.msra.gmra.mxu1 %vm133_vm3, %v1326_v52 }
0x26b8   :  { %1785 = vmatprep.mubr.msk.bf16.mxu1 %vm1923_vm1, %v1922_v0 }
0x2777   :  { %v1364_v54 = vpop.f32.mrf.mxu1 }
0x2778   :  { %v1370_v55 = vadd.f32 %v1364_v54, %v1322_v53 }
0x2779   :  { %v1771_v56 = vpop.f32.mrf.mxu1 }
0x277a   :  { %1906 = vtanh.f32 %v1370_v55  ;;  %v1570_v61 = vmul.f32 -1.442695, %v1370_v55 }
0x277b   :  { %v1367_v57 = vpop.f32.mrf.mxu1 }
0x277c   :  { %1908 = vpow2.f32 %v1570_v61 }
0x277d   :  { %v1772_v58 = vpop.f32.mrf.mxu1 }
0x2787   :  { %v1907_v59 = vpop.eup %1906 }
0x2788   :  { %1380 = vrot.lane.b32.xlu1 %v1907_v59, %s1925_s30 }
0x2789   :  { %v1909_v62 = vpop.eup %1908 }
0x278a   :  { %v1374_v63 = vadd.f32 1.0, %v1909_v62 }
0x278c   :  { %1910 = vrcp.f32 %v1374_v63 }
0x2799   :  { %v1911_v1 = vpop.eup %1910 }
0x279a   :  { %v1378_v7 = vmul.f32 %v1911_v1, %v1310_v46 }
0x27fa   :  { %v1381_v3 = vpop.permute.xlu1 %1380 }
0x27fb   :  { %v1383_v4 = vmul.f32 %v1911_v1, %v1381_v3 }
0x27fd   :  { %1385 = vrot.lane.b32.xlu0 %v1383_v4, %s1926_s3 }
0x286f   :  { %v1386_v8 = vpop.permute.xlu0 %1385 }
0x2870   :  { %v1388_v21 = vadd.f32 %v1386_v8, %v1378_v7 }
0x2872   :  { %1912 = vtanh.f32 %v1388_v21 }
0x287f   :  { %v1913_v9 = vpop.eup %1912 }
0x2880   :  { %1391 = vrot.lane.b32.xlu1 %v1913_v9, %s1925_s30 }
0x28f2   :  { %v1392_v2 = vpop.permute.xlu1 %1391 }
0x28f3   :  { %v1394_v10 = vmul.f32 %v1911_v1, %v1392_v2 }
0x28f5   :  { %v1401_v11 = vpack.c.bf16 %v1394_v10, %v1394_v10 }
0x28f7   :  { %1403 = vrot.lane.b32.xlu0 %v1401_v11, %s1926_s3 }
0x2969   :  { %v1404_v14 = vpop.permute.xlu0 %1403 }
0x296a   :  { %1778 = vmatmul.mubr.msk.bf16.vlgmr.msra.gmra.mxu0 %vm133_vm3, %v1404_v14 }
0x2a2a   :  { %v1442_v43 = vpop.f32.mrf.mxu0 }
0x2a2b   :  { %v1448_v5 = vadd.f32 %v1442_v43, %v1400_v60 }
0x2a2c   :  { %v1779_v15 = vpop.f32.mrf.mxu0 }
0x2a2d   :  { %1914 = vtanh.f32 %v1448_v5  ;;  %v1572_v12 = vmul.f32 -1.442695, %v1448_v5 }
0x2a2e   :  { %v1445_v16 = vpop.f32.mrf.mxu0 }
0x2a2f   :  { %1916 = vpow2.f32 %v1572_v12 }
0x2a30   :  { %v1780_v17 = vpop.f32.mrf.mxu0 }
0x2a3a   :  { %v1915_v18 = vpop.eup %1914 }
0x2a3b   :  { %1458 = vrot.lane.b32.xlu1 %v1915_v18, %s1925_s30 }
0x2a3c   :  { %v1917_v19 = vpop.eup %1916 }
0x2a3d   :  { %v1452_v20 = vadd.f32 1.0, %v1917_v19 }
0x2a3f   :  { %1918 = vrcp.f32 %v1452_v20 }
0x2a4c   :  { %v1919_v22 = vpop.eup %1918 }
0x2a4d   :  { %v1456_v26 = vmul.f32 %v1919_v22, %v1388_v21 }
0x2aad   :  { %v1459_v24 = vpop.permute.xlu1 %1458 }
0x2aae   :  { %v1461_v25 = vmul.f32 %v1919_v22, %v1459_v24 }
0x2ab0   :  { %1463 = vrot.lane.b32.xlu0 %v1461_v25, %s1926_s3 }
0x2ab4   :  { %928 = vrot.lane.b32.xlu0 %v2224_v6, %s1926_s3 }
0x2ab8   :  { %1084 = vrot.lane.b32.xlu0 %v2254_v47, %s1926_s3 }
0x2abc   :  { %1240 = vrot.lane.b32.xlu0 %v2284_v27, %s1926_s3  ;;  %v64_v27 = vld [vmem:[%s2370_s9 + $0x10] sm:$0xff] }
0x2abd   :  { %v67_v13 = vpack.c.bf16 %v65_v35, %v64_v27 }
0x2abf   :  { %1782 = vmatpush3.bf16.msra.mxu1 %v67_v13 }
0x2ac0   :  { %1396 = vrot.lane.b32.xlu0 %v1394_v10, %s1926_s3  ;;  %1783 = vmatprep.subr.bf16.mxu1 %v1922_v0 }
0x2b22   :  { %v1464_v29 = vpop.permute.xlu0 %1463 }
0x2b23   :  { %v1466_v30 = vadd.f32 %v1464_v29, %v1456_v26 }
0x2b25   :  { %1920 = vtanh.f32 %v1466_v30 }
0x2b26   :  { %v929_v32 = vpop.permute.xlu0 %928 }
0x2b27   :  { %931 = vst.msk [vmem:[#allocation3] sm:$0x3] %vm206_vm4, %v929_v32 }
0x2b2a   :  { %v1085_v33 = vpop.permute.xlu0 %1084 }
0x2b2b   :  { %1087 = vst.msk [vmem:[#allocation3 + $0x4] sm:$0x3] %vm206_vm4, %v1085_v33 }
0x2b2e   :  { %v1241_v34 = vpop.permute.xlu0 %1240 }
0x2b2f   :  { %1243 = vst.msk [vmem:[#allocation3 + $0x8] sm:$0x3] %vm206_vm4, %v1241_v34 }
0x2b32   :  { %v1921_v6 = vpop.eup %1920  ;;  %v1397_v47 = vpop.permute.xlu0 %1396 }
0x2b33   :  { %1399 = vst.msk [vmem:[#allocation3 + $0xc] sm:$0x3] %vm206_vm4, %v1397_v47  ;;  %1469 = vrot.lane.b32.xlu1 %v1921_v6, %s1925_s30 }
0x2b37   :  { %1006 = vrot.lane.b32.xlu1 %v2239_v23, %s1926_s3  ;;  %v63_v23 = vld [vmem:[%s2370_s9 + $0x8] sm:$0xff] }
0x2b3b   :  { %1162 = vrot.lane.b32.xlu1 %v2269_v39, %s1926_s3  ;;  %v66_v39 = vpack.c.bf16 %v63_v23, %v62_v36 }
0x2b3d   :  { %1784 = vmatpush3.bf16.msra.mxu1 %v66_v39 }
0x2b3f   :  { %1318 = vrot.lane.b32.xlu1 %v2298_v50, %s1926_s3 }
0x2ba5   :  { %v1470_v37 = vpop.permute.xlu1 %1469 }
0x2ba6   :  { %v1472_v38 = vmul.f32 %v1919_v22, %v1470_v37 }
0x2ba8   :  { %1474 = vrot.lane.b32.xlu1 %v1472_v38, %s1926_s3 }
0x2ba9   :  { %v1007_v28 = vpop.permute.xlu1 %1006 }
0x2baa   :  { %1009 = vst.msk [vmem:[#allocation3 + $0x2] sm:$0x3] %vm206_vm4, %v1007_v28 }
0x2bad   :  { %v1163_v40 = vpop.permute.xlu1 %1162 }
0x2bae   :  { %1165 = vst.msk [vmem:[#allocation3 + $0x6] sm:$0x3] %vm206_vm4, %v1163_v40 }
0x2bb1   :  { %v1319_v41 = vpop.permute.xlu1 %1318 }
0x2bb2   :  { %1321 = vst.msk [vmem:[#allocation3 + $0xa] sm:$0x3] %vm206_vm4, %v1319_v41 }
0x2bb5   :  { %v1478_v44 = vld [vmem:[#allocation3] sm:$0xff] }
0x2c1a   :  { %v1475_v42 = vpop.permute.xlu1 %1474 }
0x2c1b   :  { %1477 = vst.msk [vmem:[#allocation3 + $0xe] sm:$0x3] %vm206_vm4, %v1475_v42 }
0x2c22   :  { %v1479_v31 = vld [vmem:[#allocation3 + $0x8] sm:$0xff] }
0x2c23   :  { %v1480_v0 = vpack.c.bf16 %v1479_v31, %v1478_v44 }
0x2c25   :  { %1786 = vmatmul.mubr.msk.bf16.vlgmr.msra.gmra.mxu1 %vm133_vm3, %v1480_v0 }
0x2ce5   :  { %v1524_v46 = vpop.f32.mrf.mxu1 }
0x2ce6   :  { %v1525_v48 = vadd.f32 %v1573_v45, %v1524_v46 }
0x2ce7   :  { %v1787_v49 = vpop.f32.mrf.mxu1 }
0x2ce8   :  { %1531 = vst.msk [vmem:[%s2372_s11] sm:$0xff] %vm81_vm2, %v1525_v48 }
0x2ce9   :  { %v1527_v50 = vpop.f32.mrf.mxu1 }
0x2cea   :  { %v1528_v51 = vadd.f32 %v1573_v45, %v1527_v50 }
0x2ceb   :  { %v1788_v52 = vpop.f32.mrf.mxu1 }
0x2cec   :  { %1532 = vst.msk [vmem:[%s2372_s11 + $0x8] sm:$0xff] %vm81_vm2, %v1528_v51 }

</bundles_post_ra>
